<compile_context>
chip_gen: v6e
topology: v6e:2x2x1
jax: 0.10.0
libtpu: 0.0.40
codegen_flags: <defaults>
</compile_context>

<pallas_src>
import jax
import jax.numpy as jnp
from jax.experimental import pallas as pl
from jax.experimental.pallas import tpu as pltpu

BN_EPS = 1e-5
NORM_EPS = 1e-12

K1, K2, K3 = 7, 5, 3
P1, P2, P3 = 3, 2, 1
STRIDE = 2


def _out_len(L, k, s, p):
    return (L + 2 * p - k) // s + 1


def siamese_forward(x_bcl, params, num_classes):
    """x_bcl: (B, C_in, L) float32, PyTorch layout. Returns logits (B, num_classes)."""
    (w1, b1, g1, t1, w2, b2, g2, t2, w3, b3, g3, t3, wp, bp, wc, bc) = params
    del b1, b2, b3  # conv biases are exactly cancelled by training-mode BN mean subtraction

    B, Cin, L = x_bcl.shape
    Cmid = w1.shape[2]
    emb = w3.shape[2]

    L1 = _out_len(L, K1, STRIDE, P1)
    L2 = _out_len(L1, K2, STRIDE, P2)
    L3 = _out_len(L2, K3, STRIDE, P3)

    # per-plane row counts for the deinterleaved (even/odd output position) scratch
    H1 = (L1 + 2 * P2 + 1) // 2
    H2 = (L2 + 2 * P3 + 1) // 2

    NC_PAD = ((num_classes + 127) // 128) * 128
    CK = K1 * Cin
    CK_PAD = ((CK + 127) // 128) * 128

    # ---------------- wrapper-side layout prep (glue) ----------------
    x_blc = jnp.transpose(x_bcl, (0, 2, 1)).astype(jnp.float32)           # (B, L, Cin)
    x_pad = jnp.pad(x_blc, ((0, 0), (P1, P1), (0, 0)))                    # (B, L+2*P1, Cin)
    # im2col for layer 1: one (B*L1, K1*Cin) @ (K1*Cin, Cmid) matmul instead of
    # 7 Cin-deep tap matmuls; contraction zero-padded to 128 lanes (dense loads).
    gidx = STRIDE * jnp.arange(L1)[:, None] + jnp.arange(K1)[None, :]     # (L1, K1)
    x_col = x_pad[:, gidx, :].reshape(B, L1, CK)
    x_col = jnp.pad(x_col, ((0, 0), (0, 0), (0, CK_PAD - CK))).astype(jnp.bfloat16)

    w1col = jnp.pad(w1.reshape(CK, Cmid),
                    ((0, CK_PAD - CK), (0, 0))).astype(jnp.bfloat16)       # (CK_PAD, Cmid)
    w2b = w2.astype(jnp.bfloat16)
    w3b = w3.astype(jnp.bfloat16)
    wpb = wp.astype(jnp.bfloat16)
    wc_pad = jnp.zeros((emb, NC_PAD), jnp.bfloat16).at[:, :num_classes].set(
        wc.astype(jnp.bfloat16))
    bc_pad = jnp.zeros((1, NC_PAD), jnp.float32).at[:, :num_classes].set(
        bc.astype(jnp.float32))

    def kernel(xcol_ref,
               w1_ref, g1_ref, t1_ref,
               w2_ref, g2_ref, t2_ref,
               w3_ref, g3_ref, t3_ref,
               wp_ref, bp_ref, wc_ref, bc_ref,
               out_ref,
               s1, s2):

        def bn_relu(acc, g_ref, t_ref):
            # training-mode BatchNorm with one-pass batch stats (sum & sum-of-squares),
            # folded into a single scale/shift pass fused with ReLU.
            n = acc.shape[0]
            col_sum = jnp.sum(acc, axis=0, keepdims=True)
            col_ssq = jnp.sum(acc * acc, axis=0, keepdims=True)
            mean = col_sum * (1.0 / n)
            var = jnp.maximum(col_ssq * (1.0 / n) - mean * mean, 0.0)
            scale = g_ref[...] * jax.lax.rsqrt(var + BN_EPS)
            shift = t_ref[...] - mean * scale
            return jnp.maximum(acc * scale + shift, 0.0)

        def zero_halos(s_ref, L_out, P):
            # zero only the 2*P halo rows (front AND back); the interior is fully
            # overwritten by the layer store below.
            C = s_ref.shape[-1]
            for q in list(range(P)) + list(range(P + L_out, 2 * P + L_out)):
                s_ref[q % 2, :, pl.ds(q // 2, 1), :] = jnp.zeros((B, 1, C), s_ref.dtype)

        def store_deinterleaved(s_ref, h_blc, P):
            # h[:, i, :] -> plane (P+i)%2, row (P+i)//2 (bf16), so the next layer's
            # stride-2 tap reads become unit-stride plane reads.
            _, L_out, C = h_blc.shape
            hb = h_blc.astype(s_ref.dtype)
            L_even = L_out - (L_out % 2)
            if L_even > 0:
                h4 = hb[:, :L_even, :].reshape(B, L_even // 2, 2, C)
                for par in (0, 1):
                    s_ref[(P + par) % 2, :,
                          pl.ds((P + par) // 2, L_even // 2), :] = h4[:, :, par, :]
            if L_out % 2 == 1:
                i = L_out - 1
                s_ref[(P + i) % 2, :, pl.ds((P + i) // 2, 1), :] = hb[:, i:i + 1, :]

        def conv_from_planes(s_ref, K, L_out, w_ref, g_ref, t_ref):
            # K per-tap matmuls over all output positions at once; taps are
            # unit-stride bf16 plane reads; single chained f32 accumulator
            # (MRB-friendly on v7x).
            acc = None
            for k in range(K):
                lhs = s_ref[k % 2, :, pl.ds(k // 2, L_out), :]            # (B,L_out,C) bf16
                lhs = lhs.reshape(B * L_out, lhs.shape[-1])
                part = jnp.dot(lhs, w_ref[k], preferred_element_type=jnp.float32)
                acc = part if acc is None else acc + part
            return bn_relu(acc, g_ref, t_ref)                             # (B*L_out, C) f32

        zero_halos(s1, L1, P2)
        zero_halos(s2, L2, P3)

        # layer 1: single im2col matmul (bf16 operands, f32 accumulation)
        acc1 = jnp.dot(xcol_ref[...].reshape(B * L1, CK_PAD), w1_ref[...],
                       preferred_element_type=jnp.float32)
        h1 = bn_relu(acc1, g1_ref, t1_ref)
        store_deinterleaved(s1, h1.reshape(B, L1, Cmid), P2)

        # layer 2
        h2 = conv_from_planes(s1, K2, L2, w2_ref, g2_ref, t2_ref)
        store_deinterleaved(s2, h2.reshape(B, L2, Cmid), P3)

        # layer 3 (activation stays in vregs; no scratch store)
        h3 = conv_from_planes(s2, K3, L3, w3_ref, g3_ref, t3_ref)

        # AdaptiveAvgPool1d(1) + squeeze
        pooled = jnp.mean(h3.reshape(B, L3, emb), axis=1)                  # (B, emb)

        # proj Linear + F.normalize(dim=-1) via rsqrt (EUP slot)
        z = jnp.dot(pooled.astype(jnp.bfloat16), wp_ref[...],
                    preferred_element_type=jnp.float32) + bp_ref[...]
        inv = jax.lax.rsqrt(jnp.maximum(jnp.sum(z * z, axis=-1, keepdims=True),
                                        NORM_EPS * NORM_EPS))
        z = z * inv

        # classifier Linear, lane-padded (unmasked vst) output
        out_ref[...] = jnp.dot(z.astype(jnp.bfloat16), wc_ref[...],
                               preferred_element_type=jnp.float32) + bc_ref[...]

    kernel_inputs = (x_col,
                     w1col, g1, t1,
                     w2b, g2, t2,
                     w3b, g3, t3,
                     wpb, bp, wc_pad, bc_pad)

    def _nbytes(a):
        return int(a.size) * a.dtype.itemsize

    scratch_bytes = (2 * B * H1 * Cmid + 2 * B * H2 * Cmid) * 2            # bf16 planes
    io_bytes = sum(_nbytes(a) for a in kernel_inputs) + B * NC_PAD * 4
    # scoped VMEM limit derived from actual buffers (+headroom), capped below the
    # v7x 64 MiB physical ceiling so the same config places on all generations.
    vmem_limit = int(min(64 << 20,
                         max(16 << 20, 2 * io_bytes + scratch_bytes + (4 << 20))))

    vmem = lambda: pl.BlockSpec(memory_space=pltpu.MemorySpace.VMEM)

    # TODO(synk): for large B*L, add a grid over batch/L1 tiles with
    # dimension_semantics=("parallel",) (both v7x TensorCores) plus a two-phase
    # cross-tile BatchNorm stat reduction, row-tile the conv matmuls so the f32
    # accumulators stay within the 64-vreg file, and pipeline the x_col HBM->VMEM
    # DMA against layer-1 compute. BN's batch coupling is why this is not done
    # for the small single-block case here.
    out_pad = pl.pallas_call(
        kernel,
        out_shape=jax.ShapeDtypeStruct((B, NC_PAD), jnp.float32),
        in_specs=[vmem() for _ in kernel_inputs],
        out_specs=vmem(),
        scratch_shapes=[
            pltpu.VMEM((2, B, H1, Cmid), jnp.bfloat16),   # layer-1 act, even/odd planes
            pltpu.VMEM((2, B, H2, Cmid), jnp.bfloat16),   # layer-2 act, even/odd planes
        ],
        compiler_params=pltpu.CompilerParams(vmem_limit_bytes=vmem_limit),
    )(*kernel_inputs)

    return out_pad[:, :num_classes]


# ---------------- pure-JAX reference (for correctness check) ----------------
def reference_forward(x_bcl, params):
    (w1, b1, g1, t1, w2, b2, g2, t2, w3, b3, g3, t3, wp, bp, wc, bc) = params

    def conv_bn_relu(x, w_kio, b, g, beta, stride, pad):
        w = jnp.transpose(w_kio, (2, 1, 0))  # (K,Cin,Cout) -> (Cout,Cin,K) OIH
        y = jax.lax.conv_general_dilated(
            x, w, window_strides=(stride,), padding=[(pad, pad)],
            dimension_numbers=("NCH", "OIH", "NCH"))
        y = y + b.reshape(1, -1, 1)
        mean = jnp.mean(y, axis=(0, 2), keepdims=True)
        var = jnp.mean((y - mean) ** 2, axis=(0, 2), keepdims=True)
        y = (y - mean) * jax.lax.rsqrt(var + BN_EPS)
        y = y * g.reshape(1, -1, 1) + beta.reshape(1, -1, 1)
        return jnp.maximum(y, 0.0)

    h = conv_bn_relu(x_bcl, w1, b1, g1, t1, 2, 3)
    h = conv_bn_relu(h, w2, b2, g2, t2, 2, 2)
    h = conv_bn_relu(h, w3, b3, g3, t3, 2, 1)
    h = jnp.mean(h, axis=2)                              # (B, emb)
    z = h @ wp + bp
    z = z / jnp.maximum(jnp.linalg.norm(z, axis=-1, keepdims=True), NORM_EPS)
    return z @ wc + bc


if __name__ == "__main__":
    B, Cin, L, num_classes = 2, 4, 16, 10
    Cmid = emb = 256

    key = jax.random.PRNGKey(0)
    ks = jax.random.split(key, 12)

    def nrm(k, shape, scale=0.05):
        return scale * jax.random.normal(k, shape, jnp.float32)

    # Conv weights in kernel layout (K, Cin, Cout); BN gamma=1, beta=0 (PyTorch init).
    w1, b1 = nrm(ks[0], (7, Cin, Cmid)), nrm(ks[1], (1, Cmid))
    g1, t1 = jnp.ones((1, Cmid), jnp.float32), jnp.zeros((1, Cmid), jnp.float32)
    w2, b2 = nrm(ks[2], (5, Cmid, Cmid)), nrm(ks[3], (1, Cmid))
    g2, t2 = jnp.ones((1, Cmid), jnp.float32), jnp.zeros((1, Cmid), jnp.float32)
    w3, b3 = nrm(ks[4], (3, Cmid, emb)), nrm(ks[5], (1, emb))
    g3, t3 = jnp.ones((1, emb), jnp.float32), jnp.zeros((1, emb), jnp.float32)
    wp, bp = nrm(ks[6], (emb, emb)), nrm(ks[7], (1, emb))
    wc, bc = nrm(ks[8], (emb, num_classes)), nrm(ks[9], (1, num_classes))

    params = (w1, b1, g1, t1, w2, b2, g2, t2, w3, b3, g3, t3, wp, bp, wc, bc)

    x = jax.random.normal(ks[10], (B, Cin, L), jnp.float32)

    logits = siamese_forward(x, params, num_classes)
    logits = jax.block_until_ready(logits)

    ref = reference_forward(x, params)
    assert logits.shape == (B, num_classes)
    assert jnp.all(jnp.isfinite(logits))
    # bf16 MXU operands (f32 accumulation) -> slightly looser tolerance than pure f32
    assert jnp.allclose(logits, ref, atol=2e-2, rtol=5e-2), (
        f"max abs diff {jnp.max(jnp.abs(logits - ref))}")

    print("KERNEL_OK")
</pallas_src>

<mosaic_0001>
module attributes {stable_mosaic.version = 11 : i64} {
  func.func @kernel(%arg0: memref<2x8x128xbf16, #tpu.memory_space<vmem>>, %arg1: memref<128x256xbf16, #tpu.memory_space<vmem>>, %arg2: memref<1x256xf32, #tpu.memory_space<vmem>>, %arg3: memref<1x256xf32, #tpu.memory_space<vmem>>, %arg4: memref<5x256x256xbf16, #tpu.memory_space<vmem>>, %arg5: memref<1x256xf32, #tpu.memory_space<vmem>>, %arg6: memref<1x256xf32, #tpu.memory_space<vmem>>, %arg7: memref<3x256x256xbf16, #tpu.memory_space<vmem>>, %arg8: memref<1x256xf32, #tpu.memory_space<vmem>>, %arg9: memref<1x256xf32, #tpu.memory_space<vmem>>, %arg10: memref<256x256xbf16, #tpu.memory_space<vmem>>, %arg11: memref<1x256xf32, #tpu.memory_space<vmem>>, %arg12: memref<256x128xbf16, #tpu.memory_space<vmem>>, %arg13: memref<1x128xf32, #tpu.memory_space<vmem>>, %arg14: memref<2x128xf32, #tpu.memory_space<vmem>>, %arg15: memref<2x2x6x256xbf16, #tpu.memory_space<vmem>>, %arg16: memref<2x2x3x256xbf16, #tpu.memory_space<vmem>>) attributes {dimension_semantics = [], scalar_prefetch = 0 : i64, scratch_operands = 2 : i64, tpu.core_type = #tpu.core_type<tc>} {
    %cst = arith.constant 0.000000e+00 : bf16
    %0 = vector.broadcast %cst : bf16 to vector<2x1x256xbf16>
    %c0 = arith.constant 0 : index
    %c0_0 = arith.constant 0 : index
    %c0_1 = arith.constant 0 : index
    %c0_2 = arith.constant 0 : index
    %1 = vector.load %arg15[%c0, %c0_0, %c0_1, %c0_2] : memref<2x2x6x256xbf16, #tpu.memory_space<vmem>>, vector<1x2x1x256xbf16>
    %2 = vector.shape_cast %1 : vector<1x2x1x256xbf16> to vector<2x1x256xbf16>
    %3 = vector.shape_cast %0 : vector<2x1x256xbf16> to vector<1x2x1x256xbf16>
    tpu.vector_store %arg15[%c0, %c0_0, %c0_1, %c0_2], %3 {strides = array<i32>} : memref<2x2x6x256xbf16, #tpu.memory_space<vmem>>, vector<1x2x1x256xbf16>,
    %cst_3 = arith.constant 0.000000e+00 : bf16
    %4 = vector.broadcast %cst_3 : bf16 to vector<2x1x256xbf16>
    %c1 = arith.constant 1 : index
    %c0_4 = arith.constant 0 : index
    %c0_5 = arith.constant 0 : index
    %c0_6 = arith.constant 0 : index
    %5 = vector.load %arg15[%c1, %c0_4, %c0_5, %c0_6] : memref<2x2x6x256xbf16, #tpu.memory_space<vmem>>, vector<1x2x1x256xbf16>
    %6 = vector.shape_cast %5 : vector<1x2x1x256xbf16> to vector<2x1x256xbf16>
    %7 = vector.shape_cast %4 : vector<2x1x256xbf16> to vector<1x2x1x256xbf16>
    tpu.vector_store %arg15[%c1, %c0_4, %c0_5, %c0_6], %7 {strides = array<i32>} : memref<2x2x6x256xbf16, #tpu.memory_space<vmem>>, vector<1x2x1x256xbf16>,
    %cst_7 = arith.constant 0.000000e+00 : bf16
    %8 = vector.broadcast %cst_7 : bf16 to vector<2x1x256xbf16>
    %c0_8 = arith.constant 0 : index
    %c0_9 = arith.constant 0 : index
    %c5 = arith.constant 5 : index
    %c0_10 = arith.constant 0 : index
    %9 = vector.load %arg15[%c0_8, %c0_9, %c5, %c0_10] : memref<2x2x6x256xbf16, #tpu.memory_space<vmem>>, vector<1x2x1x256xbf16>
    %10 = vector.shape_cast %9 : vector<1x2x1x256xbf16> to vector<2x1x256xbf16>
    %11 = vector.shape_cast %8 : vector<2x1x256xbf16> to vector<1x2x1x256xbf16>
    tpu.vector_store %arg15[%c0_8, %c0_9, %c5, %c0_10], %11 {strides = array<i32>} : memref<2x2x6x256xbf16, #tpu.memory_space<vmem>>, vector<1x2x1x256xbf16>,
    %cst_11 = arith.constant 0.000000e+00 : bf16
    %12 = vector.broadcast %cst_11 : bf16 to vector<2x1x256xbf16>
    %c1_12 = arith.constant 1 : index
    %c0_13 = arith.constant 0 : index
    %c5_14 = arith.constant 5 : index
    %c0_15 = arith.constant 0 : index
    %13 = vector.load %arg15[%c1_12, %c0_13, %c5_14, %c0_15] : memref<2x2x6x256xbf16, #tpu.memory_space<vmem>>, vector<1x2x1x256xbf16>
    %14 = vector.shape_cast %13 : vector<1x2x1x256xbf16> to vector<2x1x256xbf16>
    %15 = vector.shape_cast %12 : vector<2x1x256xbf16> to vector<1x2x1x256xbf16>
    tpu.vector_store %arg15[%c1_12, %c0_13, %c5_14, %c0_15], %15 {strides = array<i32>} : memref<2x2x6x256xbf16, #tpu.memory_space<vmem>>, vector<1x2x1x256xbf16>,
    %cst_16 = arith.constant 0.000000e+00 : bf16
    %16 = vector.broadcast %cst_16 : bf16 to vector<2x1x256xbf16>
    %c0_17 = arith.constant 0 : index
    %c0_18 = arith.constant 0 : index
    %c0_19 = arith.constant 0 : index
    %c0_20 = arith.constant 0 : index
    %17 = vector.load %arg16[%c0_17, %c0_18, %c0_19, %c0_20] : memref<2x2x3x256xbf16, #tpu.memory_space<vmem>>, vector<1x2x1x256xbf16>
    %18 = vector.shape_cast %17 : vector<1x2x1x256xbf16> to vector<2x1x256xbf16>
    %19 = vector.shape_cast %16 : vector<2x1x256xbf16> to vector<1x2x1x256xbf16>
    tpu.vector_store %arg16[%c0_17, %c0_18, %c0_19, %c0_20], %19 {strides = array<i32>} : memref<2x2x3x256xbf16, #tpu.memory_space<vmem>>, vector<1x2x1x256xbf16>,
    %cst_21 = arith.constant 0.000000e+00 : bf16
    %20 = vector.broadcast %cst_21 : bf16 to vector<2x1x256xbf16>
    %c1_22 = arith.constant 1 : index
    %c0_23 = arith.constant 0 : index
    %c2 = arith.constant 2 : index
    %c0_24 = arith.constant 0 : index
    %21 = vector.load %arg16[%c1_22, %c0_23, %c2, %c0_24] : memref<2x2x3x256xbf16, #tpu.memory_space<vmem>>, vector<1x2x1x256xbf16>
    %22 = vector.shape_cast %21 : vector<1x2x1x256xbf16> to vector<2x1x256xbf16>
    %23 = vector.shape_cast %20 : vector<2x1x256xbf16> to vector<1x2x1x256xbf16>
    tpu.vector_store %arg16[%c1_22, %c0_23, %c2, %c0_24], %23 {strides = array<i32>} : memref<2x2x3x256xbf16, #tpu.memory_space<vmem>>, vector<1x2x1x256xbf16>,
    %c0_25 = arith.constant 0 : index
    %c0_26 = arith.constant 0 : index
    %c0_27 = arith.constant 0 : index
    %24 = vector.load %arg0[%c0_25, %c0_26, %c0_27] : memref<2x8x128xbf16, #tpu.memory_space<vmem>>, vector<2x8x128xbf16>
    %25 = vector.shape_cast %24 : vector<2x8x128xbf16> to vector<16x128xbf16>
    %c0_28 = arith.constant 0 : index
    %c0_29 = arith.constant 0 : index
    %26 = vector.load %arg1[%c0_28, %c0_29] : memref<128x256xbf16, #tpu.memory_space<vmem>>, vector<128x256xbf16>
    %cst_30 = arith.constant dense<0.000000e+00> : vector<16x256xf32>
    %27 = tpu.matmul %25, %26, %cst_30 {dimension_numbers = #tpu.dot_dimension_numbers<[1], [0], [0], [1], [0, 0, 1, 1], [], []>} : vector<16x128xbf16>, vector<128x256xbf16>, vector<16x256xf32> -> vector<16x256xf32>
    %cst_31 = arith.constant dense<0.000000e+00> : vector<256xf32>
    %28 = vector.multi_reduction <add>, %27, %cst_31 [0] : vector<16x256xf32> to vector<256xf32>
    %29 = vector.shape_cast %28 : vector<256xf32> to vector<1x256xf32>
    %30 = arith.mulf %27, %27 : vector<16x256xf32>
    %cst_32 = arith.constant dense<0.000000e+00> : vector<256xf32>
    %31 = vector.multi_reduction <add>, %30, %cst_32 [0] : vector<16x256xf32> to vector<256xf32>
    %32 = vector.shape_cast %31 : vector<256xf32> to vector<1x256xf32>
    %cst_33 = arith.constant 6.250000e-02 : f32
    %33 = vector.broadcast %cst_33 : f32 to vector<1x256xf32>
    %34 = arith.mulf %29, %33 : vector<1x256xf32>
    %cst_34 = arith.constant 6.250000e-02 : f32
    %35 = vector.broadcast %cst_34 : f32 to vector<1x256xf32>
    %36 = arith.mulf %32, %35 : vector<1x256xf32>
    %37 = arith.mulf %34, %34 : vector<1x256xf32>
    %38 = arith.subf %36, %37 : vector<1x256xf32>
    %cst_35 = arith.constant 0.000000e+00 : f32
    %39 = vector.broadcast %cst_35 : f32 to vector<1x256xf32>
    %40 = arith.maximumf %38, %39 : vector<1x256xf32>
    %c0_36 = arith.constant 0 : index
    %c0_37 = arith.constant 0 : index
    %41 = vector.load %arg2[%c0_36, %c0_37] : memref<1x256xf32, #tpu.memory_space<vmem>>, vector<1x256xf32>
    %cst_38 = arith.constant 9.99999974E-6 : f32
    %42 = vector.broadcast %cst_38 : f32 to vector<1x256xf32>
    %43 = arith.addf %40, %42 : vector<1x256xf32>
    %44 = math.rsqrt %43 : vector<1x256xf32>
    %45 = arith.mulf %41, %44 : vector<1x256xf32>
    %c0_39 = arith.constant 0 : index
    %c0_40 = arith.constant 0 : index
    %46 = vector.load %arg3[%c0_39, %c0_40] : memref<1x256xf32, #tpu.memory_space<vmem>>, vector<1x256xf32>
    %47 = arith.mulf %34, %45 : vector<1x256xf32>
    %48 = arith.subf %46, %47 : vector<1x256xf32>
    %49 = vector.broadcast %45 : vector<1x256xf32> to vector<16x256xf32>
    %50 = arith.mulf %27, %49 : vector<16x256xf32>
    %51 = vector.broadcast %48 : vector<1x256xf32> to vector<16x256xf32>
    %52 = arith.addf %50, %51 : vector<16x256xf32>
    %cst_41 = arith.constant 0.000000e+00 : f32
    %53 = vector.broadcast %cst_41 : f32 to vector<16x256xf32>
    %54 = arith.maximumf %52, %53 : vector<16x256xf32>
    %55 = vector.shape_cast %54 : vector<16x256xf32> to vector<2x8x256xf32>
    %56 = arith.truncf %55 : vector<2x8x256xf32> to vector<2x8x256xbf16>
    %57 = vector.shape_cast %56 : vector<2x8x256xbf16> to vector<2x4x2x256xbf16>
    %58 = vector.extract_strided_slice %57 {offsets = [0, 0, 0, 0], sizes = [2, 4, 1, 256], strides = [1, 1, 1, 1]} : vector<2x4x2x256xbf16> to vector<2x4x1x256xbf16>
    %59 = vector.shape_cast %58 : vector<2x4x1x256xbf16> to vector<2x4x256xbf16>
    %c0_42 = arith.constant 0 : index
    %c0_43 = arith.constant 0 : index
    %c1_44 = arith.constant 1 : index
    %c0_45 = arith.constant 0 : index
    %60 = vector.load %arg15[%c0_42, %c0_43, %c1_44, %c0_45] : memref<2x2x6x256xbf16, #tpu.memory_space<vmem>>, vector<1x2x4x256xbf16>
    %61 = vector.shape_cast %60 : vector<1x2x4x256xbf16> to vector<2x4x256xbf16>
    %62 = vector.shape_cast %59 : vector<2x4x256xbf16> to vector<1x2x4x256xbf16>
    tpu.vector_store %arg15[%c0_42, %c0_43, %c1_44, %c0_45], %62 {strides = array<i32>} : memref<2x2x6x256xbf16, #tpu.memory_space<vmem>>, vector<1x2x4x256xbf16>,
    %63 = vector.extract_strided_slice %57 {offsets = [0, 0, 1, 0], sizes = [2, 4, 1, 256], strides = [1, 1, 1, 1]} : vector<2x4x2x256xbf16> to vector<2x4x1x256xbf16>
    %64 = vector.shape_cast %63 : vector<2x4x1x256xbf16> to vector<2x4x256xbf16>
    %c1_46 = arith.constant 1 : index
    %c0_47 = arith.constant 0 : index
    %c1_48 = arith.constant 1 : index
    %c0_49 = arith.constant 0 : index
    %65 = vector.load %arg15[%c1_46, %c0_47, %c1_48, %c0_49] : memref<2x2x6x256xbf16, #tpu.memory_space<vmem>>, vector<1x2x4x256xbf16>
    %66 = vector.shape_cast %65 : vector<1x2x4x256xbf16> to vector<2x4x256xbf16>
    %67 = vector.shape_cast %64 : vector<2x4x256xbf16> to vector<1x2x4x256xbf16>
    tpu.vector_store %arg15[%c1_46, %c0_47, %c1_48, %c0_49], %67 {strides = array<i32>} : memref<2x2x6x256xbf16, #tpu.memory_space<vmem>>, vector<1x2x4x256xbf16>,
    %c0_50 = arith.constant 0 : index
    %c0_51 = arith.constant 0 : index
    %c0_52 = arith.constant 0 : index
    %c0_53 = arith.constant 0 : index
    %68 = vector.load %arg15[%c0_50, %c0_51, %c0_52, %c0_53] : memref<2x2x6x256xbf16, #tpu.memory_space<vmem>>, vector<1x2x4x256xbf16>
    %69 = vector.shape_cast %68 : vector<1x2x4x256xbf16> to vector<2x4x256xbf16>
    %70 = vector.shape_cast %69 : vector<2x4x256xbf16> to vector<8x256xbf16>
    %c0_54 = arith.constant 0 : index
    %c0_55 = arith.constant 0 : index
    %c0_56 = arith.constant 0 : index
    %71 = vector.load %arg4[%c0_54, %c0_55, %c0_56] : memref<5x256x256xbf16, #tpu.memory_space<vmem>>, vector<1x256x256xbf16>
    %72 = vector.shape_cast %71 : vector<1x256x256xbf16> to vector<256x256xbf16>
    %cst_57 = arith.constant dense<0.000000e+00> : vector<8x256xf32>
    %73 = tpu.matmul %70, %72, %cst_57 {dimension_numbers = #tpu.dot_dimension_numbers<[1], [0], [0], [1], [0, 0, 1, 1], [], []>} : vector<8x256xbf16>, vector<256x256xbf16>, vector<8x256xf32> -> vector<8x256xf32>
    %c1_58 = arith.constant 1 : index
    %c0_59 = arith.constant 0 : index
    %c0_60 = arith.constant 0 : index
    %c0_61 = arith.constant 0 : index
    %74 = vector.load %arg15[%c1_58, %c0_59, %c0_60, %c0_61] : memref<2x2x6x256xbf16, #tpu.memory_space<vmem>>, vector<1x2x4x256xbf16>
    %75 = vector.shape_cast %74 : vector<1x2x4x256xbf16> to vector<2x4x256xbf16>
    %76 = vector.shape_cast %75 : vector<2x4x256xbf16> to vector<8x256xbf16>
    %c1_62 = arith.constant 1 : index
    %c0_63 = arith.constant 0 : index
    %c0_64 = arith.constant 0 : index
    %77 = vector.load %arg4[%c1_62, %c0_63, %c0_64] : memref<5x256x256xbf16, #tpu.memory_space<vmem>>, vector<1x256x256xbf16>
    %78 = vector.shape_cast %77 : vector<1x256x256xbf16> to vector<256x256xbf16>
    %cst_65 = arith.constant dense<0.000000e+00> : vector<8x256xf32>
    %79 = tpu.matmul %76, %78, %cst_65 {dimension_numbers = #tpu.dot_dimension_numbers<[1], [0], [0], [1], [0, 0, 1, 1], [], []>} : vector<8x256xbf16>, vector<256x256xbf16>, vector<8x256xf32> -> vector<8x256xf32>
    %80 = arith.addf %73, %79 : vector<8x256xf32>
    %c0_66 = arith.constant 0 : index
    %c0_67 = arith.constant 0 : index
    %c1_68 = arith.constant 1 : index
    %c0_69 = arith.constant 0 : index
    %81 = vector.load %arg15[%c0_66, %c0_67, %c1_68, %c0_69] : memref<2x2x6x256xbf16, #tpu.memory_space<vmem>>, vector<1x2x4x256xbf16>
    %82 = vector.shape_cast %81 : vector<1x2x4x256xbf16> to vector<2x4x256xbf16>
    %83 = vector.shape_cast %82 : vector<2x4x256xbf16> to vector<8x256xbf16>
    %c2_70 = arith.constant 2 : index
    %c0_71 = arith.constant 0 : index
    %c0_72 = arith.constant 0 : index
    %84 = vector.load %arg4[%c2_70, %c0_71, %c0_72] : memref<5x256x256xbf16, #tpu.memory_space<vmem>>, vector<1x256x256xbf16>
    %85 = vector.shape_cast %84 : vector<1x256x256xbf16> to vector<256x256xbf16>
    %cst_73 = arith.constant dense<0.000000e+00> : vector<8x256xf32>
    %86 = tpu.matmul %83, %85, %cst_73 {dimension_numbers = #tpu.dot_dimension_numbers<[1], [0], [0], [1], [0, 0, 1, 1], [], []>} : vector<8x256xbf16>, vector<256x256xbf16>, vector<8x256xf32> -> vector<8x256xf32>
    %87 = arith.addf %80, %86 : vector<8x256xf32>
    %c1_74 = arith.constant 1 : index
    %c0_75 = arith.constant 0 : index
    %c1_76 = arith.constant 1 : index
    %c0_77 = arith.constant 0 : index
    %88 = vector.load %arg15[%c1_74, %c0_75, %c1_76, %c0_77] : memref<2x2x6x256xbf16, #tpu.memory_space<vmem>>, vector<1x2x4x256xbf16>
    %89 = vector.shape_cast %88 : vector<1x2x4x256xbf16> to vector<2x4x256xbf16>
    %90 = vector.shape_cast %89 : vector<2x4x256xbf16> to vector<8x256xbf16>
    %c3 = arith.constant 3 : index
    %c0_78 = arith.constant 0 : index
    %c0_79 = arith.constant 0 : index
    %91 = vector.load %arg4[%c3, %c0_78, %c0_79] : memref<5x256x256xbf16, #tpu.memory_space<vmem>>, vector<1x256x256xbf16>
    %92 = vector.shape_cast %91 : vector<1x256x256xbf16> to vector<256x256xbf16>
    %cst_80 = arith.constant dense<0.000000e+00> : vector<8x256xf32>
    %93 = tpu.matmul %90, %92, %cst_80 {dimension_numbers = #tpu.dot_dimension_numbers<[1], [0], [0], [1], [0, 0, 1, 1], [], []>} : vector<8x256xbf16>, vector<256x256xbf16>, vector<8x256xf32> -> vector<8x256xf32>
    %94 = arith.addf %87, %93 : vector<8x256xf32>
    %c0_81 = arith.constant 0 : index
    %c0_82 = arith.constant 0 : index
    %c2_83 = arith.constant 2 : index
    %c0_84 = arith.constant 0 : index
    %95 = vector.load %arg15[%c0_81, %c0_82, %c2_83, %c0_84] : memref<2x2x6x256xbf16, #tpu.memory_space<vmem>>, vector<1x2x4x256xbf16>
    %96 = vector.shape_cast %95 : vector<1x2x4x256xbf16> to vector<2x4x256xbf16>
    %97 = vector.shape_cast %96 : vector<2x4x256xbf16> to vector<8x256xbf16>
    %c4 = arith.constant 4 : index
    %c0_85 = arith.constant 0 : index
    %c0_86 = arith.constant 0 : index
    %98 = vector.load %arg4[%c4, %c0_85, %c0_86] : memref<5x256x256xbf16, #tpu.memory_space<vmem>>, vector<1x256x256xbf16>
    %99 = vector.shape_cast %98 : vector<1x256x256xbf16> to vector<256x256xbf16>
    %cst_87 = arith.constant dense<0.000000e+00> : vector<8x256xf32>
    %100 = tpu.matmul %97, %99, %cst_87 {dimension_numbers = #tpu.dot_dimension_numbers<[1], [0], [0], [1], [0, 0, 1, 1], [], []>} : vector<8x256xbf16>, vector<256x256xbf16>, vector<8x256xf32> -> vector<8x256xf32>
    %101 = arith.addf %94, %100 : vector<8x256xf32>
    %cst_88 = arith.constant dense<0.000000e+00> : vector<256xf32>
    %102 = vector.multi_reduction <add>, %101, %cst_88 [0] : vector<8x256xf32> to vector<256xf32>
    %103 = vector.shape_cast %102 : vector<256xf32> to vector<1x256xf32>
    %104 = arith.mulf %101, %101 : vector<8x256xf32>
    %cst_89 = arith.constant dense<0.000000e+00> : vector<256xf32>
    %105 = vector.multi_reduction <add>, %104, %cst_89 [0] : vector<8x256xf32> to vector<256xf32>
    %106 = vector.shape_cast %105 : vector<256xf32> to vector<1x256xf32>
    %cst_90 = arith.constant 1.250000e-01 : f32
    %107 = vector.broadcast %cst_90 : f32 to vector<1x256xf32>
    %108 = arith.mulf %103, %107 : vector<1x256xf32>
    %cst_91 = arith.constant 1.250000e-01 : f32
    %109 = vector.broadcast %cst_91 : f32 to vector<1x256xf32>
    %110 = arith.mulf %106, %109 : vector<1x256xf32>
    %111 = arith.mulf %108, %108 : vector<1x256xf32>
    %112 = arith.subf %110, %111 : vector<1x256xf32>
    %cst_92 = arith.constant 0.000000e+00 : f32
    %113 = vector.broadcast %cst_92 : f32 to vector<1x256xf32>
    %114 = arith.maximumf %112, %113 : vector<1x256xf32>
    %c0_93 = arith.constant 0 : index
    %c0_94 = arith.constant 0 : index
    %115 = vector.load %arg5[%c0_93, %c0_94] : memref<1x256xf32, #tpu.memory_space<vmem>>, vector<1x256xf32>
    %cst_95 = arith.constant 9.99999974E-6 : f32
    %116 = vector.broadcast %cst_95 : f32 to vector<1x256xf32>
    %117 = arith.addf %114, %116 : vector<1x256xf32>
    %118 = math.rsqrt %117 : vector<1x256xf32>
    %119 = arith.mulf %115, %118 : vector<1x256xf32>
    %c0_96 = arith.constant 0 : index
    %c0_97 = arith.constant 0 : index
    %120 = vector.load %arg6[%c0_96, %c0_97] : memref<1x256xf32, #tpu.memory_space<vmem>>, vector<1x256xf32>
    %121 = arith.mulf %108, %119 : vector<1x256xf32>
    %122 = arith.subf %120, %121 : vector<1x256xf32>
    %123 = vector.broadcast %119 : vector<1x256xf32> to vector<8x256xf32>
    %124 = arith.mulf %101, %123 : vector<8x256xf32>
    %125 = vector.broadcast %122 : vector<1x256xf32> to vector<8x256xf32>
    %126 = arith.addf %124, %125 : vector<8x256xf32>
    %cst_98 = arith.constant 0.000000e+00 : f32
    %127 = vector.broadcast %cst_98 : f32 to vector<8x256xf32>
    %128 = arith.maximumf %126, %127 : vector<8x256xf32>
    %129 = vector.shape_cast %128 : vector<8x256xf32> to vector<2x4x256xf32>
    %130 = arith.truncf %129 : vector<2x4x256xf32> to vector<2x4x256xbf16>
    %131 = vector.shape_cast %130 : vector<2x4x256xbf16> to vector<2x2x2x256xbf16>
    %132 = vector.extract_strided_slice %131 {offsets = [0, 0, 0, 0], sizes = [2, 2, 1, 256], strides = [1, 1, 1, 1]} : vector<2x2x2x256xbf16> to vector<2x2x1x256xbf16>
    %133 = vector.shape_cast %132 : vector<2x2x1x256xbf16> to vector<2x2x256xbf16>
    %c1_99 = arith.constant 1 : index
    %c0_100 = arith.constant 0 : index
    %c0_101 = arith.constant 0 : index
    %c0_102 = arith.constant 0 : index
    %134 = vector.load %arg16[%c1_99, %c0_100, %c0_101, %c0_102] : memref<2x2x3x256xbf16, #tpu.memory_space<vmem>>, vector<1x2x2x256xbf16>
    %135 = vector.shape_cast %134 : vector<1x2x2x256xbf16> to vector<2x2x256xbf16>
    %136 = vector.shape_cast %133 : vector<2x2x256xbf16> to vector<1x2x2x256xbf16>
    tpu.vector_store %arg16[%c1_99, %c0_100, %c0_101, %c0_102], %136 {strides = array<i32>} : memref<2x2x3x256xbf16, #tpu.memory_space<vmem>>, vector<1x2x2x256xbf16>,
    %137 = vector.extract_strided_slice %131 {offsets = [0, 0, 1, 0], sizes = [2, 2, 1, 256], strides = [1, 1, 1, 1]} : vector<2x2x2x256xbf16> to vector<2x2x1x256xbf16>
    %138 = vector.shape_cast %137 : vector<2x2x1x256xbf16> to vector<2x2x256xbf16>
    %c0_103 = arith.constant 0 : index
    %c0_104 = arith.constant 0 : index
    %c1_105 = arith.constant 1 : index
    %c0_106 = arith.constant 0 : index
    %139 = vector.load %arg16[%c0_103, %c0_104, %c1_105, %c0_106] : memref<2x2x3x256xbf16, #tpu.memory_space<vmem>>, vector<1x2x2x256xbf16>
    %140 = vector.shape_cast %139 : vector<1x2x2x256xbf16> to vector<2x2x256xbf16>
    %141 = vector.shape_cast %138 : vector<2x2x256xbf16> to vector<1x2x2x256xbf16>
    tpu.vector_store %arg16[%c0_103, %c0_104, %c1_105, %c0_106], %141 {strides = array<i32>} : memref<2x2x3x256xbf16, #tpu.memory_space<vmem>>, vector<1x2x2x256xbf16>,
    %c0_107 = arith.constant 0 : index
    %c0_108 = arith.constant 0 : index
    %c0_109 = arith.constant 0 : index
    %c0_110 = arith.constant 0 : index
    %142 = vector.load %arg16[%c0_107, %c0_108, %c0_109, %c0_110] : memref<2x2x3x256xbf16, #tpu.memory_space<vmem>>, vector<1x2x2x256xbf16>
    %143 = vector.shape_cast %142 : vector<1x2x2x256xbf16> to vector<2x2x256xbf16>
    %144 = vector.shape_cast %143 : vector<2x2x256xbf16> to vector<4x256xbf16>
    %c0_111 = arith.constant 0 : index
    %c0_112 = arith.constant 0 : index
    %c0_113 = arith.constant 0 : index
    %145 = vector.load %arg7[%c0_111, %c0_112, %c0_113] : memref<3x256x256xbf16, #tpu.memory_space<vmem>>, vector<1x256x256xbf16>
    %146 = vector.shape_cast %145 : vector<1x256x256xbf16> to vector<256x256xbf16>
    %cst_114 = arith.constant dense<0.000000e+00> : vector<4x256xf32>
    %147 = tpu.matmul %144, %146, %cst_114 {dimension_numbers = #tpu.dot_dimension_numbers<[1], [0], [0], [1], [0, 0, 1, 1], [], []>} : vector<4x256xbf16>, vector<256x256xbf16>, vector<4x256xf32> -> vector<4x256xf32>
    %c1_115 = arith.constant 1 : index
    %c0_116 = arith.constant 0 : index
    %c0_117 = arith.constant 0 : index
    %c0_118 = arith.constant 0 : index
    %148 = vector.load %arg16[%c1_115, %c0_116, %c0_117, %c0_118] : memref<2x2x3x256xbf16, #tpu.memory_space<vmem>>, vector<1x2x2x256xbf16>
    %149 = vector.shape_cast %148 : vector<1x2x2x256xbf16> to vector<2x2x256xbf16>
    %150 = vector.shape_cast %149 : vector<2x2x256xbf16> to vector<4x256xbf16>
    %c1_119 = arith.constant 1 : index
    %c0_120 = arith.constant 0 : index
    %c0_121 = arith.constant 0 : index
    %151 = vector.load %arg7[%c1_119, %c0_120, %c0_121] : memref<3x256x256xbf16, #tpu.memory_space<vmem>>, vector<1x256x256xbf16>
    %152 = vector.shape_cast %151 : vector<1x256x256xbf16> to vector<256x256xbf16>
    %cst_122 = arith.constant dense<0.000000e+00> : vector<4x256xf32>
    %153 = tpu.matmul %150, %152, %cst_122 {dimension_numbers = #tpu.dot_dimension_numbers<[1], [0], [0], [1], [0, 0, 1, 1], [], []>} : vector<4x256xbf16>, vector<256x256xbf16>, vector<4x256xf32> -> vector<4x256xf32>
    %154 = arith.addf %147, %153 : vector<4x256xf32>
    %c0_123 = arith.constant 0 : index
    %c0_124 = arith.constant 0 : index
    %c1_125 = arith.constant 1 : index
    %c0_126 = arith.constant 0 : index
    %155 = vector.load %arg16[%c0_123, %c0_124, %c1_125, %c0_126] : memref<2x2x3x256xbf16, #tpu.memory_space<vmem>>, vector<1x2x2x256xbf16>
    %156 = vector.shape_cast %155 : vector<1x2x2x256xbf16> to vector<2x2x256xbf16>
    %157 = vector.shape_cast %156 : vector<2x2x256xbf16> to vector<4x256xbf16>
    %c2_127 = arith.constant 2 : index
    %c0_128 = arith.constant 0 : index
    %c0_129 = arith.constant 0 : index
    %158 = vector.load %arg7[%c2_127, %c0_128, %c0_129] : memref<3x256x256xbf16, #tpu.memory_space<vmem>>, vector<1x256x256xbf16>
    %159 = vector.shape_cast %158 : vector<1x256x256xbf16> to vector<256x256xbf16>
    %cst_130 = arith.constant dense<0.000000e+00> : vector<4x256xf32>
    %160 = tpu.matmul %157, %159, %cst_130 {dimension_numbers = #tpu.dot_dimension_numbers<[1], [0], [0], [1], [0, 0, 1, 1], [], []>} : vector<4x256xbf16>, vector<256x256xbf16>, vector<4x256xf32> -> vector<4x256xf32>
    %161 = arith.addf %154, %160 : vector<4x256xf32>
    %cst_131 = arith.constant dense<0.000000e+00> : vector<256xf32>
    %162 = vector.multi_reduction <add>, %161, %cst_131 [0] : vector<4x256xf32> to vector<256xf32>
    %163 = vector.shape_cast %162 : vector<256xf32> to vector<1x256xf32>
    %164 = arith.mulf %161, %161 : vector<4x256xf32>
    %cst_132 = arith.constant dense<0.000000e+00> : vector<256xf32>
    %165 = vector.multi_reduction <add>, %164, %cst_132 [0] : vector<4x256xf32> to vector<256xf32>
    %166 = vector.shape_cast %165 : vector<256xf32> to vector<1x256xf32>
    %cst_133 = arith.constant 2.500000e-01 : f32
    %167 = vector.broadcast %cst_133 : f32 to vector<1x256xf32>
    %168 = arith.mulf %163, %167 : vector<1x256xf32>
    %cst_134 = arith.constant 2.500000e-01 : f32
    %169 = vector.broadcast %cst_134 : f32 to vector<1x256xf32>
    %170 = arith.mulf %166, %169 : vector<1x256xf32>
    %171 = arith.mulf %168, %168 : vector<1x256xf32>
    %172 = arith.subf %170, %171 : vector<1x256xf32>
    %cst_135 = arith.constant 0.000000e+00 : f32
    %173 = vector.broadcast %cst_135 : f32 to vector<1x256xf32>
    %174 = arith.maximumf %172, %173 : vector<1x256xf32>
    %c0_136 = arith.constant 0 : index
    %c0_137 = arith.constant 0 : index
    %175 = vector.load %arg8[%c0_136, %c0_137] : memref<1x256xf32, #tpu.memory_space<vmem>>, vector<1x256xf32>
    %cst_138 = arith.constant 9.99999974E-6 : f32
    %176 = vector.broadcast %cst_138 : f32 to vector<1x256xf32>
    %177 = arith.addf %174, %176 : vector<1x256xf32>
    %178 = math.rsqrt %177 : vector<1x256xf32>
    %179 = arith.mulf %175, %178 : vector<1x256xf32>
    %c0_139 = arith.constant 0 : index
    %c0_140 = arith.constant 0 : index
    %180 = vector.load %arg9[%c0_139, %c0_140] : memref<1x256xf32, #tpu.memory_space<vmem>>, vector<1x256xf32>
    %181 = arith.mulf %168, %179 : vector<1x256xf32>
    %182 = arith.subf %180, %181 : vector<1x256xf32>
    %183 = vector.broadcast %179 : vector<1x256xf32> to vector<4x256xf32>
    %184 = arith.mulf %161, %183 : vector<4x256xf32>
    %185 = vector.broadcast %182 : vector<1x256xf32> to vector<4x256xf32>
    %186 = arith.addf %184, %185 : vector<4x256xf32>
    %cst_141 = arith.constant 0.000000e+00 : f32
    %187 = vector.broadcast %cst_141 : f32 to vector<4x256xf32>
    %188 = arith.maximumf %186, %187 : vector<4x256xf32>
    %189 = vector.shape_cast %188 : vector<4x256xf32> to vector<2x2x256xf32>
    %cst_142 = arith.constant dense<0.000000e+00> : vector<2x256xf32>
    %190 = vector.multi_reduction <add>, %189, %cst_142 [1] : vector<2x2x256xf32> to vector<2x256xf32>
    %cst_143 = arith.constant 2.000000e+00 : f32
    %191 = vector.broadcast %cst_143 : f32 to vector<2x256xf32>
    %192 = arith.divf %190, %191 : vector<2x256xf32>
    %193 = arith.truncf %192 : vector<2x256xf32> to vector<2x256xbf16>
    %c0_144 = arith.constant 0 : index
    %c0_145 = arith.constant 0 : index
    %194 = vector.load %arg10[%c0_144, %c0_145] : memref<256x256xbf16, #tpu.memory_space<vmem>>, vector<256x256xbf16>
    %cst_146 = arith.constant dense<0.000000e+00> : vector<2x256xf32>
    %195 = tpu.matmul %193, %194, %cst_146 {dimension_numbers = #tpu.dot_dimension_numbers<[1], [0], [0], [1], [0, 0, 1, 1], [], []>} : vector<2x256xbf16>, vector<256x256xbf16>, vector<2x256xf32> -> vector<2x256xf32>
    %c0_147 = arith.constant 0 : index
    %c0_148 = arith.constant 0 : index
    %196 = vector.load %arg11[%c0_147, %c0_148] : memref<1x256xf32, #tpu.memory_space<vmem>>, vector<1x256xf32>
    %197 = vector.broadcast %196 : vector<1x256xf32> to vector<2x256xf32>
    %198 = arith.addf %195, %197 : vector<2x256xf32>
    %199 = arith.mulf %198, %198 : vector<2x256xf32>
    %cst_149 = arith.constant dense<0.000000e+00> : vector<2xf32>
    %200 = vector.multi_reduction <add>, %199, %cst_149 [1] : vector<2x256xf32> to vector<2xf32>
    %201 = vector.shape_cast %200 : vector<2xf32> to vector<2x1xf32>
    %cst_150 = arith.constant 1.000000e-24 : f32
    %202 = vector.broadcast %cst_150 : f32 to vector<2x1xf32>
    %203 = arith.maximumf %201, %202 : vector<2x1xf32>
    %204 = math.rsqrt %203 : vector<2x1xf32>
    %205 = vector.broadcast %204 : vector<2x1xf32> to vector<2x256xf32>
    %206 = arith.mulf %198, %205 : vector<2x256xf32>
    %207 = arith.truncf %206 : vector<2x256xf32> to vector<2x256xbf16>
    %c0_151 = arith.constant 0 : index
    %c0_152 = arith.constant 0 : index
    %208 = vector.load %arg12[%c0_151, %c0_152] : memref<256x128xbf16, #tpu.memory_space<vmem>>, vector<256x128xbf16>
    %cst_153 = arith.constant dense<0.000000e+00> : vector<2x128xf32>
    %209 = tpu.matmul %207, %208, %cst_153 {dimension_numbers = #tpu.dot_dimension_numbers<[1], [0], [0], [1], [0, 0, 1, 1], [], []>} : vector<2x256xbf16>, vector<256x128xbf16>, vector<2x128xf32> -> vector<2x128xf32>
    %c0_154 = arith.constant 0 : index
    %c0_155 = arith.constant 0 : index
    %210 = vector.load %arg13[%c0_154, %c0_155] : memref<1x128xf32, #tpu.memory_space<vmem>>, vector<1x128xf32>
    %211 = vector.broadcast %210 : vector<1x128xf32> to vector<2x128xf32>
    %212 = arith.addf %209, %211 : vector<2x128xf32>
    %c0_156 = arith.constant 0 : index
    %c0_157 = arith.constant 0 : index
    %213 = vector.load %arg14[%c0_156, %c0_157] : memref<2x128xf32, #tpu.memory_space<vmem>>, vector<2x128xf32>
    tpu.vector_store %arg14[%c0_156, %c0_157], %212 {strides = array<i32>} : memref<2x128xf32, #tpu.memory_space<vmem>>, vector<2x128xf32>,
    return
  }
}

</mosaic_0001>

<bundles_post_ra>
// kernel: tpu_custom_call.1
= control target key start
LH: loop header
LB: loop body
LE: loop exit
PB: predicated region body
PF: predicated region fallthrough
CT: control target
= control target key end

     0   :  { %19 = vsyncpa [#allocation5], 0  ;;  %s5434_s0 = inlined_call_operand.hbm [shape: bf16[2,8,128], index: 0, kind: input, shape index: {}]   ;;  %s5435_s1 = inlined_call_operand.hbm [shape: bf16[128,256], index: 1, kind: input, shape index: {}]   ;;  %s5436_s2 = inlined_call_operand.vmem [shape: f32[1,256], index: 2, kind: input, shape index: {}]   ;;  %s5437_s3 = inlined_call_operand.vmem [shape: f32[1,256], index: 3, kind: input, shape index: {}]   ;;  %s5438_s4 = inlined_call_operand.hbm [shape: bf16[5,256,256], index: 4, kind: input, shape index: {}]   ;;  %s5439_s5 = inlined_call_operand.vmem [shape: f32[1,256], index: 5, kind: input, shape index: {}]   ;;  %s5440_s6 = inlined_call_operand.vmem [shape: f32[1,256], index: 6, kind: input, shape index: {}]   ;;  %s5441_s7 = inlined_call_operand.hbm [shape: bf16[3,256,256], index: 7, kind: input, shape index: {}]   ;;  %s5442_s8 = inlined_call_operand.vmem [shape: f32[1,256], index: 8, kind: input, shape index: {}]   ;;  %s5443_s9 = inlined_call_operand.vmem [shape: f32[1,256], index: 9, kind: input, shape index: {}]   ;;  %s5444_s10 = inlined_call_operand.hbm [shape: bf16[256,256], index: 10, kind: input, shape index: {}]   ;;  %s5445_s11 = inlined_call_operand.vmem [shape: f32[1,256], index: 11, kind: input, shape index: {}]   ;;  %s5446_s12 = inlined_call_operand.hbm [shape: bf16[256,128], index: 12, kind: input, shape index: {}]   ;;  %s5447_s13 = inlined_call_operand.vmem [shape: f32[1,128], index: 13, kind: input, shape index: {}]   ;;  %s5448_s14 = inlined_call_operand.hbm [shape: f32[2,128], index: 14, kind: output, shape index: {}]  }
   0x1   :  { %20 = vsyncpa [#allocation8], 0 }
   0x2   :  { %21 = vsyncpa [#allocation11], 0 }
   0x3   :  { %22 = vsyncpa [#allocation14], 0 }
   0x4   :  { %23 = vsyncpa [#allocation6], 0  ;;  %s4971_s29 = smov [#allocation7]  }
   0x5   :  { %s41_s30 = sshll.u32 %s4971_s29, 4  ;;  %s42_s30 = int_to_ptr.vmem [resolvable:$true] %s41_s30 }
   0x6   :  { %s4829_s15 = scalar_lea.vmem %s42_s30, 2048  ;;  %p4834_p1 = scmp.lt.s32.totalorder %s42_s30, %s42_s30 }
   0x7   :  { %p4830_p0 = scmp.ne.s32.totalorder %s42_s30, %s4829_s15  ;;  %p4835_p2 = scmp.lt.s32.totalorder %s4829_s15, %s4829_s15 }
   0x9   :  { %p4836_p3 = por %p4835_p2, %p4834_p1 }
   0xb   :  { %p4837_p4 = pnand %p4836_p3, %p4830_p0 }
   0xd   :  { %4840 = shalt.err (!%p4837_p4)
}
   0xe   :  { %s4972_s16 = smov 128   ;;  %s4973_s17 = smov 8  }
   0xf   :  { %47 = dma.hbm_to_vmem [thread:$0]  %s5435_s1, 2048, %s42_s30, [#allocation8], %s4972_s16, %s4972_s16, %s4973_s17  }
  0x10   :  { %s4974_s20 = smov [#allocation10]   ;;  %s4975_s22 = smov [#allocation4]  }
  0x11   :  { %s73_s21 = sshll.u32 %s4974_s20, 4  ;;  %s29_s23 = sshll.u32 %s4975_s22, 4  ;;  %s74_s21 = int_to_ptr.vmem [resolvable:$true] %s73_s21  ;;  %s30_s23 = int_to_ptr.vmem [resolvable:$true] %s29_s23 }
  0x12   :  { %s4849_s24 = scalar_lea.vmem %s74_s21, 12288  ;;  %p4854_p6 = scmp.lt.s32.totalorder %s74_s21, %s74_s21 }
  0x13   :  { %p4850_p5 = scmp.ne.s32.totalorder %s74_s21, %s4849_s24  ;;  %p4855_p7 = scmp.lt.s32.totalorder %s4849_s24, %s4849_s24 }
  0x15   :  { %p4856_p8 = por %p4855_p7, %p4854_p6 }
  0x17   :  { %p4857_p9 = pnand %p4856_p8, %p4850_p5 }
  0x19   :  { %4860 = shalt.err (!%p4857_p9)
}
  0x1a   :  { %79 = dma.hbm_to_vmem [thread:$0]  %s5441_s7, 12288, %s74_s21, [#allocation11], %s4972_s16, %s4972_s16, %s4973_s17  }
  0x1b   :  { %s4869_s1 = scalar_lea.vmem %s30_s23, 128  ;;  %p4874_p11 = scmp.lt.s32.totalorder %s30_s23, %s30_s23 }
  0x1c   :  { %p4870_p10 = scmp.ne.s32.totalorder %s30_s23, %s4869_s1  ;;  %p4875_p12 = scmp.lt.s32.totalorder %s4869_s1, %s4869_s1 }
  0x1e   :  { %p4876_p13 = por %p4875_p12, %p4874_p11 }
  0x20   :  { %p4877_p0 = pnand %p4876_p13, %p4870_p10 }
  0x22   :  { %4880 = shalt.err (!%p4877_p0)
}
  0x23   :  { %s4976_s27 = smov 64   ;;  %s4977_s28 = smov 4  }
  0x24   :  { %35 = dma.hbm_to_vmem [thread:$0]  %s5434_s0, 128, %s30_s23, [#allocation5], %s4976_s27, %s4976_s27, %s4977_s28  }
  0x25   :  { %s4978_s15 = smov [#allocation9]   ;;  %s4979_s7 = smov [#allocation12]  }
  0x26   :  { %s57_s18 = sshll.u32 %s4978_s15, 4  ;;  %s89_s19 = sshll.u32 %s4979_s7, 4  ;;  %s58_s18 = int_to_ptr.vmem [resolvable:$true] %s57_s18  ;;  %s90_s19 = int_to_ptr.vmem [resolvable:$true] %s89_s19 }
  0x27   :  { %s4889_s20 = scalar_lea.vmem %s58_s18, 20480  ;;  %p4894_p2 = scmp.lt.s32.totalorder %s58_s18, %s58_s18 }
  0x28   :  { %p4890_p1 = scmp.ne.s32.totalorder %s58_s18, %s4889_s20  ;;  %p4895_p3 = scmp.lt.s32.totalorder %s4889_s20, %s4889_s20 }
  0x2a   :  { %p4896_p4 = por %p4895_p3, %p4894_p2 }
  0x2c   :  { %p4897_p5 = pnand %p4896_p4, %p4890_p1 }
  0x2e   :  { %4900 = shalt.err (!%p4897_p5)
}
  0x2f   :  { %63 = dma.hbm_to_vmem [thread:$0]  %s5438_s4, 20480, %s58_s18, [#allocation8], %s4972_s16, %s4972_s16, %s4973_s17  }
  0x30   :  { %s4909_s0 = scalar_lea.vmem %s90_s19, 4096  ;;  %p4914_p7 = scmp.lt.s32.totalorder %s90_s19, %s90_s19 }
  0x31   :  { %p4910_p6 = scmp.ne.s32.totalorder %s90_s19, %s4909_s0  ;;  %p4915_p8 = scmp.lt.s32.totalorder %s4909_s0, %s4909_s0 }
  0x33   :  { %p4916_p9 = por %p4915_p8, %p4914_p7 }
  0x35   :  { %p4917_p10 = pnand %p4916_p9, %p4910_p6 }
  0x37   :  { %4920 = shalt.err (!%p4917_p10)
}
  0x38   :  { %95 = dma.hbm_to_vmem [thread:$0]  %s5444_s10, 4096, %s90_s19, [#allocation11], %s4972_s16, %s4972_s16, %s4973_s17  }
  0x39   :  { %s4980_s25 = smov [#allocation13]  }
  0x3a   :  { %s103_s26 = sshll.u32 %s4980_s25, 4  ;;  %s104_s26 = int_to_ptr.vmem [resolvable:$true] %s103_s26 }
  0x3b   :  { %s4929_s1 = scalar_lea.vmem %s104_s26, 2048  ;;  %p4934_p12 = scmp.lt.s32.totalorder %s104_s26, %s104_s26 }
  0x3c   :  { %p4930_p11 = scmp.ne.s32.totalorder %s104_s26, %s4929_s1  ;;  %p4935_p13 = scmp.lt.s32.totalorder %s4929_s1, %s4929_s1 }
  0x3e   :  { %p4936_p0 = por %p4935_p13, %p4934_p12 }
  0x40   :  { %p4937_p1 = pnand %p4936_p0, %p4930_p11 }
  0x42   :  { %4940 = shalt.err (!%p4937_p1)
}
  0x43   :  { %109 = dma.hbm_to_vmem [thread:$0]  %s5446_s12, 2048, %s104_s26, [#allocation14], %s4976_s27, %s4976_s27, %s4977_s28  }
  0x44   :  { %4961 = dma.done.wait [#allocation5], 128  }
  0x45   :  { %4962 = vsyncadd [#allocation5], 4294967168 }
  0x46   :  { %4963 = dma.done.wait [#allocation8], 22528  }
  0x47   :  { %4964 = vsyncadd [#allocation8], 4294944768 }
  0x48   :  { %4965 = dma.done.wait [#allocation11], 16384  }
  0x49   :  { %4966 = vsyncadd [#allocation11], 4294950912 }
  0x4a   :  { %4967 = dma.done.wait [#allocation14], 2048  }
  0x4b   :  { %4968 = vsyncadd [#allocation14], 4294965248  ;;  %v4981_v0 = vmov 0   ;;  %v4334_v1 = vld [vmem:[#allocation7 + $0x74] ss:$8 sps:$4 sm:$0xff]   ;;  %vm131_vm0 = vcmask 1040384  }
  0x4c   :  { %329 = vmatprep.mubr.bf16.mxu0 %v4981_v0  ;;  %v4336_v2 = vld [vmem:[#allocation7 + $0x70] ss:$8 sps:$4 sm:$0xff]   ;;  %297 = vmatprep.subr.bf16.mxu0 %v4334_v1  ;;  %v4337_v3 = vld [vmem:[#allocation7 + $0x64] ss:$8 sps:$4 sm:$0xff]   ;;  %v4339_v4 = vld [vmem:[#allocation7 + $0x60] ss:$8 sps:$4 sm:$0xff]  }
  0x4d   :  { %298 = vmatpush1.bf16.msra.mxu0 %v4336_v2  ;;  %v4340_v5 = vld [vmem:[#allocation7 + $0x54] ss:$8 sps:$4 sm:$0xff]   ;;  %v4342_v6 = vld [vmem:[#allocation7 + $0x50] ss:$8 sps:$4 sm:$0xff]   ;;  %v4343_v7 = vld [vmem:[#allocation7 + $0x44] ss:$8 sps:$4 sm:$0xff]  }
  0x4e   :  { %299 = vmatprep.subr.bf16.mxu0 %v4337_v3  ;;  %v4345_v8 = vld [vmem:[#allocation7 + $0x40] ss:$8 sps:$4 sm:$0xff]   ;;  %v4346_v9 = vld [vmem:[#allocation7 + $0x34] ss:$8 sps:$4 sm:$0xff]   ;;  %v4348_v10 = vld [vmem:[#allocation7 + $0x30] ss:$8 sps:$4 sm:$0xff]  }
  0x4f   :  { %v4349_v11 = vld [vmem:[#allocation7 + $0x24] ss:$8 sps:$4 sm:$0xff]   ;;  %v4351_v12 = vld [vmem:[#allocation7 + $0x20] ss:$8 sps:$4 sm:$0xff]   ;;  %v4352_v13 = vld [vmem:[#allocation7 + $0x14] ss:$8 sps:$4 sm:$0xff]  }
  0x50   :  { %v4354_v14 = vld [vmem:[#allocation7 + $0x10] ss:$8 sps:$4 sm:$0xff]   ;;  %v4355_v15 = vld [vmem:[#allocation7 + $0x4] ss:$8 sps:$4 sm:$0xff]   ;;  %v4357_v16 = vld [vmem:[#allocation7] ss:$8 sps:$4 sm:$0xff]  }
  0x51   :  { %300 = vmatpush1.bf16.msra.mxu0 %v4339_v4  ;;  %v4358_v17 = vld [vmem:[#allocation4] sm:$0xff]   ;;  %vm132_vm1 = vsmask.f32 256  ;;  %vm134_vm2 = vcmask 1044484   ;;  %vm135_vm3 = vsmask.f32 4352 }
  0x52   :  { %301 = vmatprep.subr.bf16.mxu0 %v4340_v5  ;;  %vm5099_vm4 = vmand %vm131_vm0, %vm132_vm1  ;;  %v138_v19 = vld [vmem:[#allocation2] sm:$0x11]  ;;  %v141_v20 = vld [vmem:[#allocation2 + $0x8] sm:$0x11]  ;;  %vm151_vm5 = vcmask 1042434   ;;  %vm154_vm6 = vcmask 1046534  }
  0x53   :  { %vm136_vm7 = vmand %vm134_vm2, %vm135_vm3  ;;  %v145_v21 = vld [vmem:[#allocation2 + $0x10] sm:$0x11]  ;;  %v148_v22 = vld [vmem:[#allocation2 + $0x18] sm:$0x11]  ;;  %vm152_vm8 = vsmask.f32 7946 }
  0x54   :  { %vm137_vm9 = vmor %vm136_vm7, %vm5099_vm4  ;;  %vm155_vm10 = vsmask.f32 7962  ;;  %v158_v23 = vld [vmem:[#allocation2] sm:$0x44]  ;;  %v161_v24 = vld [vmem:[#allocation2 + $0x8] sm:$0x44] }
  0x55   :  { %302 = vmatpush1.bf16.msra.mxu0 %v4342_v6  ;;  %v139_v25 = vsel %vm137_vm9, 0, %v138_v19  ;;  %v142_v26 = vsel %vm137_vm9, 0, %v141_v20  ;;  %v146_v27 = vsel %vm137_vm9, 0, %v145_v21  ;;  %v149_v28 = vsel %vm137_vm9, 0, %v148_v22  ;;  %vm153_vm11 = vmand %vm151_vm5, %vm152_vm8  ;;  %v164_v29 = vld [vmem:[#allocation2 + $0x10] sm:$0x44] }
  0x56   :  { %303 = vmatprep.subr.bf16.mxu0 %v4343_v7  ;;  %140 = vst [vmem:[#allocation2] sm:$0x11] %v139_v25  ;;  %143 = vst [vmem:[#allocation2 + $0x8] sm:$0x11] %v142_v26  ;;  %v167_v30 = vld [vmem:[#allocation2 + $0x18] sm:$0x44] }
  0x57   :  { %147 = vst [vmem:[#allocation2 + $0x10] sm:$0x11] %v146_v27  ;;  %150 = vst [vmem:[#allocation2 + $0x18] sm:$0x11] %v149_v28  ;;  %v4359_v35 = vld [vmem:[#allocation9 + $0x174] ss:$8 sps:$4 sm:$0xff]  }
  0x58   :  { %vm156_vm12 = vmand %vm154_vm6, %vm155_vm10  ;;  %v4363_v36 = vld [vmem:[#allocation9 + $0x74] ss:$8 sps:$4 sm:$0xff]   ;;  %v4361_v37 = vld [vmem:[#allocation9 + $0x70] ss:$8 sps:$4 sm:$0xff]   ;;  %1002 = vmatprep.subr.bf16.mxu1 %v4359_v35  ;;  %vm180_vm14 = vcmask 1041409   ;;  %vm183_vm7 = vcmask 1043459  }
  0x59   :  { %304 = vmatpush1.bf16.msra.mxu0 %v4345_v8  ;;  %vm157_vm13 = vmor %vm156_vm12, %vm153_vm11  ;;  %v4364_v38 = vld [vmem:[#allocation9 + $0x170] ss:$8 sps:$4 sm:$0xff]   ;;  %v4365_v39 = vld [vmem:[#allocation9 + $0x164] ss:$8 sps:$4 sm:$0xff]   ;;  %vm181_vm15 = vsmask.f32 1280 }
  0x5a   :  { %305 = vmatprep.subr.bf16.mxu0 %v4346_v9  ;;  %v159_v31 = vsel %vm157_vm13, 0, %v158_v23  ;;  %v162_v32 = vsel %vm157_vm13, 0, %v161_v24  ;;  %v165_v33 = vsel %vm157_vm13, 0, %v164_v29  ;;  %v168_v34 = vsel %vm157_vm13, 0, %v167_v30  ;;  %1003 = vmatpush1.bf16.msra.mxu1 %v4364_v38  ;;  %v4369_v40 = vld [vmem:[#allocation9 + $0x64] ss:$8 sps:$4 sm:$0xff]   ;;  %vm182_vm8 = vmand %vm180_vm14, %vm181_vm15 }
  0x5b   :  { %160 = vst [vmem:[#allocation2] sm:$0x44] %v159_v31  ;;  %163 = vst [vmem:[#allocation2 + $0x8] sm:$0x44] %v162_v32  ;;  %v4367_v41 = vld [vmem:[#allocation9 + $0x60] ss:$8 sps:$4 sm:$0xff]   ;;  %1004 = vmatprep.subr.bf16.mxu1 %v4365_v39 }
  0x5c   :  { %166 = vst [vmem:[#allocation2 + $0x10] sm:$0x44] %v165_v33  ;;  %169 = vst [vmem:[#allocation2 + $0x18] sm:$0x44] %v168_v34  ;;  %v4370_v42 = vld [vmem:[#allocation9 + $0x160] ss:$8 sps:$4 sm:$0xff]  }
  0x5d   :  { %306 = vmatpush1.bf16.msra.mxu0 %v4348_v10  ;;  %v4371_v43 = vld [vmem:[#allocation9 + $0x154] ss:$8 sps:$4 sm:$0xff]   ;;  %v4373_v45 = vld [vmem:[#allocation9 + $0x50] ss:$8 sps:$4 sm:$0xff]   ;;  %v4377_v47 = vld [vmem:[#allocation9 + $0x144] ss:$8 sps:$4 sm:$0xff]  }
  0x5e   :  { %307 = vmatprep.subr.bf16.mxu0 %v4349_v11  ;;  %1005 = vmatpush1.bf16.msra.mxu1 %v4370_v42  ;;  %v4375_v44 = vld [vmem:[#allocation9 + $0x54] ss:$8 sps:$4 sm:$0xff]   ;;  %v4376_v46 = vld [vmem:[#allocation9 + $0x150] ss:$8 sps:$4 sm:$0xff]   ;;  %v4381_v48 = vld [vmem:[#allocation9 + $0x44] ss:$8 sps:$4 sm:$0xff]  }
  0x5f   :  { %1006 = vmatprep.subr.bf16.mxu1 %v4371_v43  ;;  %v4379_v49 = vld [vmem:[#allocation9 + $0x40] ss:$8 sps:$4 sm:$0xff]   ;;  %v4383_v51 = vld [vmem:[#allocation9 + $0x134] ss:$8 sps:$4 sm:$0xff]   ;;  %v4385_v53 = vld [vmem:[#allocation9 + $0x30] ss:$8 sps:$4 sm:$0xff]  }
  0x60   :  { %v4382_v50 = vld [vmem:[#allocation9 + $0x140] ss:$8 sps:$4 sm:$0xff]   ;;  %v4387_v52 = vld [vmem:[#allocation9 + $0x34] ss:$8 sps:$4 sm:$0xff]   ;;  %v4388_v54 = vld [vmem:[#allocation9 + $0x130] ss:$8 sps:$4 sm:$0xff]  }
  0x61   :  { %308 = vmatpush1.bf16.msra.mxu0 %v4351_v12  ;;  %v4389_v55 = vld [vmem:[#allocation9 + $0x124] ss:$8 sps:$4 sm:$0xff]   ;;  %v4391_v57 = vld [vmem:[#allocation9 + $0x20] ss:$8 sps:$4 sm:$0xff]   ;;  %v4395_v59 = vld [vmem:[#allocation9 + $0x114] ss:$8 sps:$4 sm:$0xff]  }
  0x62   :  { %309 = vmatprep.subr.bf16.mxu0 %v4352_v13  ;;  %1007 = vmatpush1.bf16.msra.mxu1 %v4376_v46  ;;  %v4393_v56 = vld [vmem:[#allocation9 + $0x24] ss:$8 sps:$4 sm:$0xff]   ;;  %v4394_v58 = vld [vmem:[#allocation9 + $0x120] ss:$8 sps:$4 sm:$0xff]   ;;  %v4399_v60 = vld [vmem:[#allocation9 + $0x14] ss:$8 sps:$4 sm:$0xff]  }
  0x63   :  { %1008 = vmatprep.subr.bf16.mxu1 %v4377_v47  ;;  %v4397_v61 = vld [vmem:[#allocation9 + $0x10] ss:$8 sps:$4 sm:$0xff]   ;;  %v4401_v63 = vld [vmem:[#allocation9 + $0x104] ss:$8 sps:$4 sm:$0xff]   ;;  %v4403_v1 = vld [vmem:[#allocation9] ss:$8 sps:$4 sm:$0xff]  }
  0x64   :  { %v4400_v62 = vld [vmem:[#allocation9 + $0x110] ss:$8 sps:$4 sm:$0xff]   ;;  %v4405_v0 = vld [vmem:[#allocation9 + $0x4] ss:$8 sps:$4 sm:$0xff]   ;;  %v4406_v2 = vld [vmem:[#allocation9 + $0x100] ss:$8 sps:$4 sm:$0xff]  }
  0x65   :  { %310 = vmatpush1.bf16.msra.mxu0 %v4354_v14  ;;  %v4407_v3 = vld [vmem:[#allocation9 + $0x1f4] ss:$8 sps:$4 sm:$0xff]   ;;  %v4409_v5 = vld [vmem:[#allocation9 + $0xf0] ss:$8 sps:$4 sm:$0xff]   ;;  %v4413_v7 = vld [vmem:[#allocation9 + $0x1e4] ss:$8 sps:$4 sm:$0xff]  }
  0x66   :  { %311 = vmatprep.subr.bf16.mxu0 %v4355_v15  ;;  %1009 = vmatpush1.bf16.msra.mxu1 %v4382_v50  ;;  %v4411_v4 = vld [vmem:[#allocation9 + $0xf4] ss:$8 sps:$4 sm:$0xff]   ;;  %v4412_v6 = vld [vmem:[#allocation9 + $0x1f0] ss:$8 sps:$4 sm:$0xff]   ;;  %v4417_v8 = vld [vmem:[#allocation9 + $0xe4] ss:$8 sps:$4 sm:$0xff]  }
  0x67   :  { %1010 = vmatprep.subr.bf16.mxu1 %v4383_v51  ;;  %v4415_v9 = vld [vmem:[#allocation9 + $0xe0] ss:$8 sps:$4 sm:$0xff]   ;;  %v4419_v11 = vld [vmem:[#allocation9 + $0x1d4] ss:$8 sps:$4 sm:$0xff]   ;;  %v4421_v13 = vld [vmem:[#allocation9 + $0xd0] ss:$8 sps:$4 sm:$0xff]  }
  0x68   :  { %v4418_v10 = vld [vmem:[#allocation9 + $0x1e0] ss:$8 sps:$4 sm:$0xff]   ;;  %v4423_v12 = vld [vmem:[#allocation9 + $0xd4] ss:$8 sps:$4 sm:$0xff]   ;;  %v4424_v14 = vld [vmem:[#allocation9 + $0x1d0] ss:$8 sps:$4 sm:$0xff]  }
  0x69   :  { %312 = vmatpush1.bf16.msra.mxu0 %v4357_v16  ;;  %v4425_v15 = vld [vmem:[#allocation9 + $0x1c4] ss:$8 sps:$4 sm:$0xff]   ;;  %v4430_v19 = vld [vmem:[#allocation9 + $0x1c0] ss:$8 sps:$4 sm:$0xff]   ;;  %v4431_v20 = vld [vmem:[#allocation9 + $0x1b4] ss:$8 sps:$4 sm:$0xff]  }
  0x6a   :  { %1214 = vmatprep.subr.bf16.mxu0 %v4363_v36  ;;  %1011 = vmatpush1.bf16.msra.mxu1 %v4388_v54  ;;  %v4429_v16 = vld [vmem:[#allocation9 + $0xc4] ss:$8 sps:$4 sm:$0xff]   ;;  %v4433_v21 = vld [vmem:[#allocation9 + $0xb0] ss:$8 sps:$4 sm:$0xff]   ;;  %v4435_v22 = vld [vmem:[#allocation9 + $0xb4] ss:$8 sps:$4 sm:$0xff]  }
  0x6b   :  { %1012 = vmatprep.subr.bf16.mxu1 %v4389_v55  ;;  %v4436_v23 = vld [vmem:[#allocation9 + $0x1b0] ss:$8 sps:$4 sm:$0xff]   ;;  %v4437_v24 = vld [vmem:[#allocation9 + $0x1a4] ss:$8 sps:$4 sm:$0xff]   ;;  %v4439_v26 = vld [vmem:[#allocation9 + $0xa0] ss:$8 sps:$4 sm:$0xff]  }
  0x6c   :  { %330 = vmatmul.mubr.bf16.vlgmr.msra.gmra.mxu0 %v4358_v17  ;;  %v4427_v17 = vld [vmem:[#allocation9 + $0xc0] ss:$8 sps:$4 sm:$0xff]   ;;  %v4441_v25 = vld [vmem:[#allocation9 + $0xa4] ss:$8 sps:$4 sm:$0xff]   ;;  %v4443_v28 = vld [vmem:[#allocation9 + $0x194] ss:$8 sps:$4 sm:$0xff]  }
  0x6d   :  { %1215 = vmatpush1.bf16.msra.mxu0 %v4361_v37  ;;  %v4442_v27 = vld [vmem:[#allocation9 + $0x1a0] ss:$8 sps:$4 sm:$0xff]   ;;  %v4447_v29 = vld [vmem:[#allocation9 + $0x94] ss:$8 sps:$4 sm:$0xff]   ;;  %v4445_v30 = vld [vmem:[#allocation9 + $0x90] ss:$8 sps:$4 sm:$0xff]  }
  0x6e   :  { %1216 = vmatprep.subr.bf16.mxu0 %v4369_v40  ;;  %1013 = vmatpush1.bf16.msra.mxu1 %v4394_v58  ;;  %v4448_v31 = vld [vmem:[#allocation9 + $0x190] ss:$8 sps:$4 sm:$0xff]   ;;  %v4449_v32 = vld [vmem:[#allocation9 + $0x184] ss:$8 sps:$4 sm:$0xff]   ;;  %v4451_v34 = vld [vmem:[#allocation9 + $0x80] ss:$8 sps:$4 sm:$0xff]  }
  0x6f   :  { %1014 = vmatprep.subr.bf16.mxu1 %v4395_v59  ;;  %v4453_v33 = vld [vmem:[#allocation9 + $0x84] ss:$8 sps:$4 sm:$0xff]   ;;  %v4454_v35 = vld [vmem:[#allocation9 + $0x180] ss:$8 sps:$4 sm:$0xff]   ;;  %v4457_v36 = vld [vmem:[#allocation9 + $0x274] ss:$8 sps:$4 sm:$0xff]  }
  0x70   :  { %v4460_v37 = vld [vmem:[#allocation9 + $0x374] ss:$8 sps:$4 sm:$0xff]   ;;  %vm184_vm3 = vsmask.f32 3328  ;;  %v187_v40 = vld [vmem:[#allocation3 + $0x8] sm:$0xa] }
  0x71   :  { %1217 = vmatpush1.bf16.msra.mxu0 %v4367_v41  ;;  %v190_v41 = vld [vmem:[#allocation3 + $0xc] sm:$0xa]  ;;  %vm185_vm9 = vmand %vm183_vm7, %vm184_vm3  ;;  %vm683_vm11 = vcmask 1042432   ;;  %vm684_vm12 = vsmask.f32 2306  ;;  %vm686_vm13 = vcmask 1046532  }
  0x72   :  { %1218 = vmatprep.subr.bf16.mxu0 %v4375_v44  ;;  %1015 = vmatpush1.bf16.msra.mxu1 %v4400_v62  ;;  %vm186_vm10 = vmor %vm185_vm9, %vm182_vm8  ;;  %vm687_vm3 = vsmask.f32 6418  ;;  %v4608_v18 = vld [vmem:[#allocation10 + $0x150] ss:$8 sps:$4 sm:$0xff]   ;;  %s4985_s7 = smov [#allocation15]  }
  0x73   :  { %1016 = vmatprep.subr.bf16.mxu1 %v4401_v63  ;;  %vm5213_vm8 = vmand %vm683_vm11, %vm684_vm12  ;;  %vm1275_vm11 = vsmask.f32 3336  ;;  %vm1277_vm12 = vsmask.f32 5392  ;;  %s3935_s19 = sshll.u32 %s4985_s7, 4  ;;  %s3936_s19 = int_to_ptr.vmem [resolvable:$true] %s3935_s19 }
  0x74   :  { %vm688_vm9 = vmand %vm686_vm13, %vm687_vm3  ;;  %vm1279_vm13 = vsmask.f32 7448  ;;  %s4941_s20 = scalar_lea.vmem %s3936_s19, 32  ;;  %p4946_p3 = scmp.lt.s32.totalorder %s3936_s19, %s3936_s19 }
  0x75   :  { %1219 = vmatpush1.bf16.msra.mxu0 %v4373_v45  ;;  %p4942_p2 = scmp.ne.s32.totalorder %s3936_s19, %s4941_s20  ;;  %p4947_p4 = scmp.lt.s32.totalorder %s4941_s20, %s4941_s20 }
  0x76   :  { %1220 = vmatprep.subr.bf16.mxu0 %v4381_v48  ;;  %1017 = vmatpush1.bf16.msra.mxu1 %v4406_v2  ;;  %v188_v48 = vsel %vm186_vm10, 0, %v187_v40 }
  0x77   :  { %1018 = vmatprep.subr.bf16.mxu1 %v4407_v3  ;;  %189 = vst [vmem:[#allocation3 + $0x8] sm:$0xa] %v188_v48  ;;  %p4948_p5 = por %p4947_p4, %p4946_p3 }
  0x79   :  { %1221 = vmatpush1.bf16.msra.mxu0 %v4379_v49  ;;  %v191_v49 = vsel %vm186_vm10, 0, %v190_v41  ;;  %vm5233_vm10 = vmor %vm688_vm9, %vm5213_vm8  ;;  %p4949_p6 = pnand %p4948_p5, %p4942_p2 }
  0x7a   :  { %1222 = vmatprep.subr.bf16.mxu0 %v4387_v52  ;;  %1019 = vmatpush2.bf16.msra.mxu1 %v4412_v6  ;;  %192 = vst [vmem:[#allocation3 + $0xc] sm:$0xa] %v191_v49  ;;  %vm1871_vm8 = vmor %vm131_vm0, %vm151_vm5 }
  0x7b   :  { %1020 = vmatprep.subr.bf16.mxu1 %v4413_v7  ;;  %vm1872_vm9 = vmor %vm1871_vm8, %vm134_vm2  ;;  %vm3006_vm8 = vsmask.f32 2312 }
  0x7c   :  { %vm1873_vm0 = vmor %vm1872_vm9, %vm154_vm6 }
  0x7d   :  { %1223 = vmatpush1.bf16.msra.mxu0 %v4385_v53 }
  0x7e   :  { %1224 = vmatprep.subr.bf16.mxu0 %v4393_v56  ;;  %1021 = vmatpush2.bf16.msra.mxu1 %v4418_v10 }
  0x7f   :  { %1022 = vmatprep.subr.bf16.mxu1 %v4419_v11 }
  0x81   :  { %1225 = vmatpush1.bf16.msra.mxu0 %v4391_v57 }
  0x82   :  { %1226 = vmatprep.subr.bf16.mxu0 %v4399_v60  ;;  %1023 = vmatpush2.bf16.msra.mxu1 %v4424_v14 }
  0x83   :  { %1024 = vmatprep.subr.bf16.mxu1 %v4425_v15 }
  0x85   :  { %1227 = vmatpush1.bf16.msra.mxu0 %v4397_v61 }
  0x86   :  { %1228 = vmatprep.subr.bf16.mxu0 %v4405_v0  ;;  %1025 = vmatpush2.bf16.msra.mxu1 %v4430_v19 }
  0x87   :  { %1026 = vmatprep.subr.bf16.mxu1 %v4431_v20 }
  0x89   :  { %1229 = vmatpush1.bf16.msra.mxu0 %v4403_v1 }
  0x8a   :  { %1230 = vmatprep.subr.bf16.mxu0 %v4411_v4  ;;  %1027 = vmatpush2.bf16.msra.mxu1 %v4436_v23 }
  0x8b   :  { %1028 = vmatprep.subr.bf16.mxu1 %v4437_v24 }
  0x8d   :  { %1231 = vmatpush2.bf16.msra.mxu0 %v4409_v5 }
  0x8e   :  { %1232 = vmatprep.subr.bf16.mxu0 %v4417_v8  ;;  %1029 = vmatpush2.bf16.msra.mxu1 %v4442_v27  ;;  %v4982_v27 = vmov 1966171168  }
  0x8f   :  { %1030 = vmatprep.subr.bf16.mxu1 %v4443_v28  ;;  %v391_v28 = vunpack.c.l.s4 %v4982_v27 }
  0x91   :  { %1233 = vmatpush2.bf16.msra.mxu0 %v4415_v9 }
  0x92   :  { %1234 = vmatprep.subr.bf16.mxu0 %v4423_v12  ;;  %1031 = vmatpush2.bf16.msra.mxu1 %v4448_v31 }
  0x93   :  { %1032 = vmatprep.subr.bf16.mxu1 %v4449_v32 }
  0x95   :  { %1235 = vmatpush2.bf16.msra.mxu0 %v4421_v13 }
  0x96   :  { %1236 = vmatprep.subr.bf16.mxu0 %v4429_v16  ;;  %1033 = vmatpush2.bf16.msra.mxu1 %v4454_v35 }
  0x97   :  { %1513 = vmatprep.subr.bf16.mxu1 %v4457_v36 }
  0x99   :  { %1237 = vmatpush2.bf16.msra.mxu0 %v4427_v17 }
  0x9a   :  { %1238 = vmatprep.subr.bf16.mxu0 %v4435_v22 }
  0x9d   :  { %1239 = vmatpush2.bf16.msra.mxu0 %v4433_v21 }
  0x9e   :  { %1240 = vmatprep.subr.bf16.mxu0 %v4441_v25 }
  0xa1   :  { %1241 = vmatpush2.bf16.msra.mxu0 %v4439_v26 }
  0xa2   :  { %1242 = vmatprep.subr.bf16.mxu0 %v4447_v29  ;;  %v393_v29 = vlaneseq }
  0xa4   :  { %v5131_v31 = vshrl.u32 %v393_v29, 7 }
  0xa5   :  { %1243 = vmatpush2.bf16.msra.mxu0 %v4445_v30  ;;  %v392_v30 = vunpack.c.0.s8 %v391_v28 }
  0xa6   :  { %1244 = vmatprep.subr.bf16.mxu0 %v4453_v33  ;;  %v5142_v41 = vsub.s32 0, %v5131_v31 }
  0xa7   :  { %v5134_v33 = vsub.s32 %v392_v30, %v5131_v31 }
  0xa9   :  { %1245 = vmatpush2.bf16.msra.mxu0 %v4451_v34 }
  0xaa   :  { %1808 = vmatprep.subr.bf16.mxu0 %v4460_v37  ;;  %v382_v37 = vld [vmem:[%s5436_s2] sm:$0x3] }
 0x12c   :  { %v5108_v38 = vpop.f32.mrf.mxu0 }
 0x12d   :  { %v354_v43 = vmul.f32 %v5108_v38, %v5108_v38 }
 0x12e   :  { %v5110_v39 = vpop.f32.mrf.mxu0 }
 0x12f   :  { %v355_v46 = vmul.f32 %v5110_v39, %v5110_v39 }
 0x130   :  { %v5114_v42 = vpop.f32.mrf.mxu0 }
 0x131   :  { %v340_v44 = vadd.f32 %v5114_v42, %v5108_v38  ;;  %v356_v45 = vmul.f32 %v5114_v42, %v5114_v42 }
 0x132   :  { %v5125_v47 = vpop.f32.mrf.mxu0 }
 0x133   :  { %v341_v50 = vrot.slane %v340_v44, 4  ;;  %v358_v51 = vadd.f32 %v356_v45, %v354_v43  ;;  %v347_v52 = vadd.f32 %v5125_v47, %v5110_v39  ;;  %v357_v53 = vmul.f32 %v5125_v47, %v5125_v47 }
 0x134   :  { %v5145_v43 = vsub.s32 1, %v5131_v31 }
 0x135   :  { %v342_v54 = vadd.f32 %v341_v50, %v340_v44  ;;  %v359_v55 = vrot.slane %v358_v51, 4  ;;  %v348_v56 = vrot.slane %v347_v52, 4  ;;  %v365_v57 = vadd.f32 %v357_v53, %v355_v46 }
 0x137   :  { %v343_v58 = vrot.slane %v342_v54, 2  ;;  %v360_v59 = vadd.f32 %v359_v55, %v358_v51  ;;  %v349_v60 = vadd.f32 %v348_v56, %v347_v52  ;;  %v366_v61 = vrot.slane %v365_v57, 4  ;;  %v406_v52 = vld [vmem:[%s5437_s3] sm:$0x3] }
 0x139   :  { %v344_v62 = vadd.f32 %v343_v58, %v342_v54  ;;  %v361_v63 = vrot.slane %v360_v59, 2  ;;  %v350_v0 = vrot.slane %v349_v60, 2  ;;  %v367_v1 = vadd.f32 %v366_v61, %v365_v57 }
 0x13a   :  { %v4983_v61 = vmov 1935823168  }
 0x13b   :  { %v345_v2 = vrot.slane %v344_v62, 1  ;;  %v362_v3 = vadd.f32 %v361_v63, %v360_v59  ;;  %v351_v4 = vadd.f32 %v350_v0, %v349_v60  ;;  %v368_v5 = vrot.slane %v367_v1, 2 }
 0x13d   :  { %v346_v6 = vadd.f32 %v345_v2, %v344_v62  ;;  %v363_v7 = vrot.slane %v362_v3, 1  ;;  %v352_v8 = vrot.slane %v351_v4, 1  ;;  %v369_v9 = vadd.f32 %v368_v5, %v367_v1 }
 0x13e   :  { %v521_v62 = vunpack.c.l.s4 %v4983_v61 }
 0x13f   :  { %v364_v10 = vadd.f32 %v363_v7, %v362_v3  ;;  %v372_v11 = vmul.f32 0.0625, %v346_v6  ;;  %v353_v12 = vadd.f32 %v352_v8, %v351_v4  ;;  %v370_v13 = vrot.slane %v369_v9, 1 }
 0x140   :  { %v522_v6 = vunpack.c.0.s8 %v521_v62 }
 0x141   :  { %v374_v14 = vmul.f32 0.0625, %v364_v10  ;;  %v376_v15 = vmul.f32 %v372_v11, %v372_v11  ;;  %v371_v16 = vadd.f32 %v370_v13, %v369_v9  ;;  %v373_v17 = vmul.f32 0.0625, %v353_v12 }
 0x142   :  { %v5163_v8 = vsub.s32 %v522_v6, %v5131_v31 }
 0x143   :  { %v378_v19 = vsub.f32 %v374_v14, %v376_v15  ;;  %v375_v20 = vmul.f32 0.0625, %v371_v16  ;;  %v377_v21 = vmul.f32 %v373_v17, %v373_v17 }
 0x145   :  { %v380_v22 = vmax.f32 %v378_v19, 0.0  ;;  %v379_v23 = vsub.f32 %v375_v20, %v377_v21  ;;  %v4984_v20 = vmov 1983009808  }
 0x146   :  { %v5171_v21 = vunpack.c.l.s4 %v4984_v20 }
 0x147   :  { %v383_v24 = vadd.f32 1e-05, %v380_v22  ;;  %v381_v25 = vmax.f32 %v379_v23, 0.0 }
 0x149   :  { %v384_v26 = vadd.f32 1e-05, %v381_v25  ;;  %4807 = vrsqrt.f32 %v383_v24 }
 0x14b   :  { %4809 = vrsqrt.f32 %v384_v26 }
 0x156   :  { %v4808_v32 = vpop.eup %4807 }
 0x158   :  { %v4810_v34 = vpop.eup %4809 }
 0x159   :  { %v389_v35 = vcombine.low %v4808_v32, %v4810_v34 }
 0x15b   :  { %v396_v36 = vrot.slane %v389_v35, %v5134_v33 }
 0x15d   :  { %v403_v40 = vrot.slane %v396_v36, %v5134_v33 }
 0x15f   :  { %v405_v44 = vmul.f32 %v403_v40, %v382_v37 }
 0x161   :  { %v411_v45 = vrot.slane %v405_v44, %v5142_v41  ;;  %v415_v46 = vrot.slane %v405_v44, %v5145_v43 }
 0x163   :  { %v418_v48 = vmul.f32 %v411_v45, %v372_v11  ;;  %v419_v49 = vmul.f32 %v415_v46, %v373_v17  ;;  %v439_v55 = vmul.f32 %v411_v45, %v5108_v38  ;;  %v440_v56 = vmul.f32 %v415_v46, %v5110_v39 }
 0x164   :  { %v441_v57 = vmul.f32 %v411_v45, %v5114_v42  ;;  %v442_v58 = vmul.f32 %v415_v46, %v5125_v47 }
 0x165   :  { %v422_v50 = vcombine.low %v418_v48, %v419_v49 }
 0x167   :  { %v429_v51 = vrot.slane %v422_v50, %v5134_v33 }
 0x169   :  { %v436_v53 = vrot.slane %v429_v51, %v5134_v33 }
 0x16b   :  { %v438_v54 = vsub.f32 %v406_v52, %v436_v53 }
 0x16d   :  { %v447_v59 = vrot.slane %v438_v54, %v5142_v41  ;;  %v451_v60 = vrot.slane %v438_v54, %v5145_v43 }
 0x16f   :  { %v454_v63 = vadd.f32 %v447_v59, %v439_v55  ;;  %v455_v0 = vadd.f32 %v451_v60, %v440_v56  ;;  %v456_v1 = vadd.f32 %v447_v59, %v441_v57  ;;  %v457_v2 = vadd.f32 %v451_v60, %v442_v58 }
 0x171   :  { %v458_v3 = vmax.f32 %v454_v63, 0.0  ;;  %v459_v4 = vmax.f32 %v455_v0, 0.0  ;;  %v460_v5 = vmax.f32 %v456_v1, 0.0  ;;  %v461_v38 = vmax.f32 %v457_v2, 0.0 }
 0x173   :  { %v3964_v39 = vpack.c.bf16 %v459_v4, %v458_v3  ;;  %v3965_v7 = vpack.c.bf16 %v461_v38, %v460_v5 }
 0x175   :  { %v477_v42 = vrot.slane %v3964_v39, %v5134_v33  ;;  %v502_v47 = vrot.slane %v3965_v7, %v5134_v33 }
 0x177   :  { %v478_v9 = vcombine.high %v477_v42, %v477_v42  ;;  %v485_v10 = vrot.slane %v477_v42, %v5134_v33  ;;  %v503_v11 = vcombine.high %v502_v47, %v502_v47  ;;  %v510_v12 = vrot.slane %v502_v47, %v5134_v33 }
 0x179   :  { %v492_v13 = vrot.slane %v478_v9, %v5134_v33  ;;  %v493_v14 = vcombine.high %v485_v10, %v485_v10  ;;  %v517_v15 = vrot.slane %v503_v11, %v5134_v33  ;;  %v518_v16 = vcombine.high %v510_v12, %v510_v12 }
 0x17a   :  { %v526_v17 = vrot.slane %v485_v10, %v5163_v8  ;;  %v582_v19 = vrot.slane %v510_v12, %v5163_v8 }
 0x17b   :  { %v494_v22 = vcombine.high %v492_v13, %v492_v13  ;;  %v519_v23 = vcombine.high %v517_v15, %v517_v15  ;;  %v540_v24 = vrot.slane %v492_v13, %v5163_v8  ;;  %v554_v25 = vrot.slane %v493_v14, %v5163_v8 }
 0x17c   :  { %v5176_v26 = vrot.slane %v526_v17, %v5163_v8  ;;  %v5179_v27 = vrot.slane %v582_v19, %v5163_v8  ;;  %v596_v28 = vrot.slane %v517_v15, %v5163_v8  ;;  %v610_v29 = vrot.slane %v518_v16, %v5163_v8 }
 0x17d   :  { %v547_v30 = vrot.slane %v540_v24, %v5163_v8  ;;  %v5185_v32 = vrot.slane %v554_v25, %v5163_v8  ;;  %v568_v34 = vrot.slane %v494_v22, %v5163_v8  ;;  %v624_v35 = vrot.slane %v519_v23, %v5163_v8  ;;  %v690_v23 = vld [vmem:[#allocation2] sm:$0x77] }
 0x17e   :  { %v5190_v36 = vrot.slane %v596_v28, %v5163_v8  ;;  %v5193_v37 = vrot.slane %v610_v29, %v5163_v8  ;;  %v632_v40 = vunpack.c.l.b16 %v5176_v26  ;;  %v633_v44 = vunpack.c.h.b16 %v5176_v26 }
 0x17f   :  { %v575_v45 = vrot.slane %v568_v34, %v5163_v8  ;;  %v5199_v46 = vrot.slane %v624_v35, %v5163_v8  ;;  %v634_v48 = vunpack.c.l.b16 %v547_v30  ;;  %v635_v49 = vunpack.c.h.b16 %v547_v30 }
 0x180   :  { %v636_v50 = vunpack.c.l.b16 %v5185_v32  ;;  %v637_v51 = vunpack.c.h.b16 %v5185_v32  ;;  %v640_v52 = vunpack.c.l.b16 %v5179_v27  ;;  %v641_v53 = vunpack.c.h.b16 %v5179_v27 }
 0x181   :  { %v638_v54 = vunpack.c.l.b16 %v575_v45  ;;  %v639_v55 = vunpack.c.h.b16 %v575_v45  ;;  %v642_v56 = vunpack.c.l.b16 %v5190_v36  ;;  %v643_v57 = vunpack.c.h.b16 %v5190_v36 }
 0x182   :  { %v644_v58 = vunpack.c.l.b16 %v5193_v37  ;;  %v645_v59 = vunpack.c.h.b16 %v5193_v37  ;;  %v646_v60 = vunpack.c.l.b16 %v5199_v46  ;;  %v647_v61 = vunpack.c.h.b16 %v5199_v46  ;;  %v693_v37 = vld [vmem:[#allocation2 + $0x8] sm:$0x77] }
 0x183   :  { %v648_v62 = vrot.slane %v632_v40, 7  ;;  %v649_v63 = vrot.slane %v634_v48, 6  ;;  %v652_v0 = vrot.slane %v636_v50, 5  ;;  %v655_v1 = vrot.slane %v638_v54, 4 }
 0x184   :  { %v658_v2 = vrot.slane %v633_v44, 7  ;;  %v659_v3 = vrot.slane %v635_v49, 6  ;;  %v661_v4 = vrot.slane %v637_v51, 5  ;;  %v663_v5 = vrot.slane %v639_v55, 4 }
 0x185   :  { %v651_v6 = vsel %vm151_vm5, %v649_v63, %v648_v62  ;;  %v665_v39 = vrot.slane %v640_v52, 7  ;;  %v666_v7 = vrot.slane %v642_v56, 6  ;;  %v668_v42 = vrot.slane %v644_v58, 5 }
 0x186   :  { %v654_v47 = vsel %vm183_vm7, %v652_v0, %v651_v6  ;;  %v660_v9 = vsel %vm151_vm5, %v659_v3, %v658_v2  ;;  %v670_v10 = vrot.slane %v646_v60, 4  ;;  %v672_v11 = vrot.slane %v641_v53, 7 }
 0x187   :  { %v657_v12 = vsel %vm134_vm2, %v655_v1, %v654_v47  ;;  %v662_v13 = vsel %vm183_vm7, %v661_v4, %v660_v9  ;;  %v667_v14 = vsel %vm151_vm5, %v666_v7, %v665_v39  ;;  %v673_v15 = vrot.slane %v643_v57, 6  ;;  %v724_v4 = vld [vmem:[#allocation2 + $0x10] sm:$0x77] }
 0x188   :  { %v664_v16 = vsel %vm134_vm2, %v663_v5, %v662_v13  ;;  %v669_v17 = vsel %vm183_vm7, %v668_v42, %v667_v14  ;;  %v675_v19 = vrot.slane %v645_v59, 5  ;;  %v677_v20 = vrot.slane %v647_v61, 4 }
 0x189   :  { %v671_v24 = vsel %vm134_vm2, %v670_v10, %v669_v17  ;;  %v674_v25 = vsel %vm151_vm5, %v673_v15, %v672_v11  ;;  %v679_v26 = vpack.c.b16 %v664_v16, %v657_v12  ;;  %v696_v28 = vrot.slane %v634_v48, 7 }
 0x18a   :  { %v676_v29 = vsel %vm183_vm7, %v675_v19, %v674_v25  ;;  %v698_v30 = vrot.slane %v636_v50, 6  ;;  %v700_v32 = vrot.slane %v638_v54, 5  ;;  %v702_v34 = vrot.slane %v635_v49, 7 }
 0x18b   :  { %v678_v35 = vsel %vm134_vm2, %v677_v20, %v676_v29  ;;  %v691_v36 = vsel %vm5233_vm10, %v679_v26, %v690_v23  ;;  %v697_v45 = vsel %vm151_vm5, %v696_v28, %v632_v40  ;;  %v704_v46 = vrot.slane %v637_v51, 6  ;;  %v4458_v23 = vld [vmem:[#allocation9 + $0x370] ss:$8 sps:$4 sm:$0xff]   ;;  %v4496_v29 = vld [vmem:[#allocation9 + $0x314] ss:$8 sps:$4 sm:$0xff]  }
 0x18c   :  { %v680_v62 = vpack.c.b16 %v678_v35, %v671_v24  ;;  %v699_v63 = vsel %vm183_vm7, %v698_v30, %v697_v45  ;;  %v703_v0 = vsel %vm151_vm5, %v702_v34, %v633_v44  ;;  %v706_v48 = vrot.slane %v639_v55, 5  ;;  %692 = vst [vmem:[#allocation2] sm:$0x77] %v691_v36  ;;  %v4466_v34 = vld [vmem:[#allocation9 + $0x364] ss:$8 sps:$4 sm:$0xff]  }
 0x18d   :  { %v701_v50 = vsel %vm134_vm2, %v700_v32, %v699_v63  ;;  %v705_v49 = vsel %vm183_vm7, %v704_v46, %v703_v0  ;;  %v708_v54 = vrot.slane %v642_v56, 7  ;;  %v710_v1 = vrot.slane %v644_v58, 6 }
 0x18e   :  { %v694_v2 = vsel %vm5233_vm10, %v680_v62, %v693_v37  ;;  %v707_v3 = vsel %vm134_vm2, %v706_v48, %v705_v49  ;;  %v712_v40 = vrot.slane %v646_v60, 5  ;;  %v714_v51 = vrot.slane %v643_v57, 7 }
 0x18f   :  { %v709_v44 = vsel %vm151_vm5, %v708_v54, %v640_v52  ;;  %v716_v55 = vrot.slane %v645_v59, 6  ;;  %v718_v5 = vrot.slane %v647_v61, 5  ;;  %v720_v38 = vpack.c.b16 %v707_v3, %v701_v50  ;;  %695 = vst [vmem:[#allocation2 + $0x8] sm:$0x77] %v694_v2  ;;  %v727_v59 = vld [vmem:[#allocation2 + $0x18] sm:$0x77] }
 0x190   :  { %v711_v6 = vsel %vm183_vm7, %v710_v1, %v709_v44  ;;  %v715_v56 = vsel %vm151_vm5, %v714_v51, %v641_v53  ;;  %v834_v58 = vunpack.c.0.s8 %v5171_v21  ;;  %v4464_v1 = vld [vmem:[#allocation9 + $0x360] ss:$8 sps:$4 sm:$0xff]  }
 0x191   :  { %v713_v60 = vsel %vm134_vm2, %v712_v40, %v711_v6  ;;  %v717_v57 = vsel %vm183_vm7, %v716_v55, %v715_v56  ;;  %v725_v39 = vsel %vm5233_vm10, %v720_v38, %v724_v4  ;;  %vm1276_vm7 = vmor %vm181_vm15, %vm1275_vm11  ;;  %v4472_v4 = vld [vmem:[#allocation9 + $0x354] ss:$8 sps:$4 sm:$0xff]   ;;  %vm2418_vm11 = vcmask 1041408  }
 0x192   :  { %v719_v52 = vsel %vm134_vm2, %v718_v5, %v717_v57  ;;  %726 = vst [vmem:[#allocation2 + $0x10] sm:$0x77] %v725_v39  ;;  %v5265_v27 = vsub.s32 %v834_v58, %v5131_v31  ;;  %vm1278_vm3 = vmor %vm1276_vm7, %vm1277_vm12  ;;  %vm170_vm2 = vsmask.f32 2304  ;;  %vm2421_vm12 = vcmask 1043458  }
 0x193   :  { %v721_v61 = vpack.c.b16 %v719_v52, %v713_v60  ;;  %v3966_v7 = vld.sshfl [vmem:[#allocation2] sm:$0xf pattern:$0x76325410]  ;;  %vm5272_vm15 = vmor %vm1278_vm3, %vm1279_vm13  ;;  %v4455_v60 = vld [vmem:[#allocation9 + $0x270] ss:$8 sps:$4 sm:$0xff]  }
 0x194   :  { %v4034_v53 = vld.sshfl [vmem:[#allocation2] sm:$0x5f pattern:$0x76325410]  ;;  %vm171_vm6 = vmand %vm151_vm5, %vm170_vm2  ;;  %vm2422_vm7 = vsmask.f32 3338 }
 0x195   :  { %v728_v21 = vsel %vm5233_vm10, %v721_v61, %v727_v59  ;;  %v1266_v42 = vcombine.high %v4034_v53, %v4034_v53  ;;  %v1282_v47 = vshrl.u32 %v4034_v53, 16  ;;  %v1285_v9 = vshll.u32 %v4034_v53, 16  ;;  %v4463_v52 = vld [vmem:[#allocation9 + $0x264] ss:$8 sps:$4 sm:$0xff]   ;;  %vm172_vm10 = vmor %vm171_vm6, %vm5099_vm4 }
 0x196   :  { %729 = vst [vmem:[#allocation2 + $0x18] sm:$0x77] %v728_v21  ;;  %v3967_v10 = vld.sshfl [vmem:[#allocation2 + $0x8] sm:$0xf pattern:$0x76325410] }
 0x197   :  { %v1043_v11 = vcombine.low %v3966_v7, %v3967_v10  ;;  %v4035_v12 = vld.sshfl [vmem:[#allocation2 + $0x8] sm:$0x5f pattern:$0x76325410]  ;;  %v1284_v13 = vrot.slane %v1282_v47, 6  ;;  %v1287_v14 = vrot.slane %v1285_v9, 7 }
 0x198   :  { %v1274_v15 = vcombine.high %v4035_v12, %v4035_v12  ;;  %v1291_v31 = vshll.u32 %v1266_v42, 16  ;;  %v1296_v16 = vshrl.u32 %v4035_v12, 16  ;;  %v1299_v17 = vshll.u32 %v4035_v12, 16  ;;  %v4470_v7 = vld [vmem:[#allocation9 + $0x350] ss:$8 sps:$4 sm:$0xff]  }
 0x199   :  { %v3968_v19 = vld.sshfl [vmem:[#allocation2 + $0x10] sm:$0xf pattern:$0x76325410]  ;;  %v1050_v20 = vrot.slane %v1043_v11, %v5265_v27  ;;  %v1288_v22 = vor.u32 %v1287_v14, %v1284_v13  ;;  %v4478_v47 = vld [vmem:[#allocation9 + $0x344] ss:$8 sps:$4 sm:$0xff]  }
 0x19a   :  { %v1298_v24 = vrot.slane %v1296_v16, 6  ;;  %v1301_v25 = vrot.slane %v1299_v17, 7  ;;  %v1305_v26 = vshll.u32 %v1274_v15, 16  ;;  %v1293_v35 = vrot.slane %v1291_v31, 7  ;;  %v4461_v9 = vld [vmem:[#allocation9 + $0x260] ss:$8 sps:$4 sm:$0xff]  }
 0x19b   :  { %v1051_v28 = vcombine.high %v1050_v20, %v1050_v20  ;;  %v1289_v30 = vrot.slane %v1288_v22, 2  ;;  %v4068_v32 = vld.sshfl [vmem:[#allocation2 + $0x10] sm:$0x5f pattern:$0x76325410] }
 0x19c   :  { %v1302_v36 = vor.u32 %v1301_v25, %v1298_v24  ;;  %v1567_v37 = vcombine.high %v4068_v32, %v4068_v32  ;;  %v1577_v45 = vshrl.u32 %v4068_v32, 16  ;;  %v1307_v62 = vrot.slane %v1305_v26, 7  ;;  %v4469_v13 = vld [vmem:[#allocation9 + $0x254] ss:$8 sps:$4 sm:$0xff]   ;;  %v4476_v15 = vld [vmem:[#allocation9 + $0x340] ss:$8 sps:$4 sm:$0xff]  }
 0x19d   :  { %v3969_v46 = vld.sshfl [vmem:[#allocation2 + $0x18] sm:$0xf pattern:$0x76325410]  ;;  %1246 = vmatprep.mubr.bf16.mxu0 %v1051_v28  ;;  %v1580_v63 = vshll.u32 %v4068_v32, 16  ;;  %v1294_v48 = vsel %vm5272_vm15, %v1289_v30, %v1293_v35 }
 0x19e   :  { %v831_v0 = vcombine.low %v3968_v19, %v3969_v46  ;;  %1247 = vmatmul.mubr.bf16.vlgmr.msra.gmra.mxu0 %v1050_v20  ;;  %v1303_v50 = vrot.slane %v1302_v36, 2  ;;  %v4069_v49 = vld.sshfl [vmem:[#allocation2 + $0x18] sm:$0x5f pattern:$0x76325410]  ;;  %v1579_v54 = vrot.slane %v1577_v45, 6 }
 0x19f   :  { %1809 = vmatpush1.bf16.msra.mxu0 %v4458_v23  ;;  %v1575_v2 = vcombine.high %v4069_v49, %v4069_v49  ;;  %v1582_v3 = vrot.slane %v1580_v63, 7  ;;  %v1591_v40 = vshrl.u32 %v4069_v49, 16  ;;  %v1586_v55 = vshll.u32 %v1567_v37, 16  ;;  %v4484_v16 = vld [vmem:[#allocation9 + $0x334] ss:$8 sps:$4 sm:$0xff]  }
 0x1a0   :  { %v838_v51 = vrot.slane %v831_v0, %v5265_v27  ;;  %1810 = vmatprep.subr.bf16.mxu0 %v4466_v34  ;;  %v1308_v44 = vsel %vm5272_vm15, %v1303_v50, %v1307_v62  ;;  %v1594_v5 = vshll.u32 %v4069_v49, 16  ;;  %v4467_v17 = vld [vmem:[#allocation9 + $0x250] ss:$8 sps:$4 sm:$0xff]   ;;  %v4475_v20 = vld [vmem:[#allocation9 + $0x244] ss:$8 sps:$4 sm:$0xff]  }
 0x1a1   :  { %v1342_v38 = vcombine.low %v1294_v48, %v1308_v44  ;;  %v1583_v6 = vor.u32 %v1582_v3, %v1579_v54  ;;  %v1593_v56 = vrot.slane %v1591_v40, 6  ;;  %v1600_v39 = vshll.u32 %v1575_v2, 16  ;;  %v4482_v22 = vld [vmem:[#allocation9 + $0x330] ss:$8 sps:$4 sm:$0xff]   ;;  %v4490_v24 = vld [vmem:[#allocation9 + $0x324] ss:$8 sps:$4 sm:$0xff]  }
 0x1a2   :  { %v839_v58 = vcombine.high %v838_v51, %v838_v51  ;;  %v1596_v57 = vrot.slane %v1594_v5, 7  ;;  %v1588_v53 = vrot.slane %v1586_v55, 7  ;;  %v4473_v25 = vld [vmem:[#allocation9 + $0x240] ss:$8 sps:$4 sm:$0xff]   ;;  %v4481_v26 = vld [vmem:[#allocation9 + $0x234] ss:$8 sps:$4 sm:$0xff]  }
 0x1a3   :  { %1811 = vmatpush1.bf16.msra.mxu0 %v4464_v1  ;;  %v5282_v59 = vrot.slane %v1342_v38, %v5265_v27  ;;  %v1584_v61 = vrot.slane %v1583_v6, 2  ;;  %v1602_v12 = vrot.slane %v1600_v39, 7  ;;  %v4488_v28 = vld [vmem:[#allocation9 + $0x320] ss:$8 sps:$4 sm:$0xff]   ;;  %v4479_v30 = vld [vmem:[#allocation9 + $0x230] ss:$8 sps:$4 sm:$0xff]  }
 0x1a4   :  { %1034 = vmatprep.mubr.bf16.mxu1 %v839_v58  ;;  %1812 = vmatprep.subr.bf16.mxu0 %v4472_v4  ;;  %v1597_v21 = vor.u32 %v1596_v57, %v1593_v56  ;;  %v4487_v32 = vld [vmem:[#allocation9 + $0x224] ss:$8 sps:$4 sm:$0xff]   ;;  %v4494_v34 = vld [vmem:[#allocation9 + $0x310] ss:$8 sps:$4 sm:$0xff]   ;;  %v4485_v36 = vld [vmem:[#allocation9 + $0x220] ss:$8 sps:$4 sm:$0xff]  }
 0x1a5   :  { %1035 = vmatmul.mubr.bf16.vlgmr.msra.gmra.mxu1 %v838_v51  ;;  %v1350_v42 = vcombine.high %v5282_v59, %v5282_v59  ;;  %v1589_v10 = vsel %vm5272_vm15, %v1584_v61, %v1588_v53  ;;  %v4502_v35 = vld [vmem:[#allocation9 + $0x304] ss:$8 sps:$4 sm:$0xff]   ;;  %v4493_v37 = vld [vmem:[#allocation9 + $0x214] ss:$8 sps:$4 sm:$0xff]   ;;  %v4500_v45 = vld [vmem:[#allocation9 + $0x300] ss:$8 sps:$4 sm:$0xff]  }
 0x1a6   :  { %1514 = vmatpush1.bf16.msra.mxu1 %v4455_v60  ;;  %v1598_v11 = vrot.slane %v1597_v21, 2  ;;  %v4508_v46 = vld [vmem:[#allocation9 + $0x3f4] ss:$8 sps:$4 sm:$0xff]   ;;  %v4491_v62 = vld [vmem:[#allocation9 + $0x210] ss:$8 sps:$4 sm:$0xff]  }
 0x1a7   :  { %1515 = vmatprep.subr.bf16.mxu1 %v4463_v52  ;;  %1545 = vmatprep.mubr.bf16.mxu1 %v1350_v42  ;;  %v4499_v63 = vld [vmem:[#allocation9 + $0x204] ss:$8 sps:$4 sm:$0xff]   ;;  %v4506_v0 = vld [vmem:[#allocation9 + $0x3f0] ss:$8 sps:$4 sm:$0xff]   ;;  %v4497_v50 = vld [vmem:[#allocation9 + $0x200] ss:$8 sps:$4 sm:$0xff]  }
 0x1a8   :  { %1813 = vmatpush1.bf16.msra.mxu0 %v4470_v7  ;;  %v1603_v14 = vsel %vm5272_vm15, %v1598_v11, %v1602_v12  ;;  %v4514_v48 = vld [vmem:[#allocation9 + $0x3e4] ss:$8 sps:$4 sm:$0xff]   ;;  %v4505_v49 = vld [vmem:[#allocation9 + $0x2f4] ss:$8 sps:$4 sm:$0xff]   ;;  %v4512_v54 = vld [vmem:[#allocation9 + $0x3e0] ss:$8 sps:$4 sm:$0xff]  }
 0x1a9   :  { %v1637_v31 = vcombine.low %v1589_v10, %v1603_v14  ;;  %1814 = vmatprep.subr.bf16.mxu0 %v4478_v47  ;;  %v4520_v1 = vld [vmem:[#allocation9 + $0x3d4] ss:$8 sps:$4 sm:$0xff]   ;;  %v4503_v2 = vld [vmem:[#allocation9 + $0x2f0] ss:$8 sps:$4 sm:$0xff]   ;;  %v4511_v3 = vld [vmem:[#allocation9 + $0x2e4] ss:$8 sps:$4 sm:$0xff]  }
 0x1aa   :  { %1516 = vmatpush1.bf16.msra.mxu1 %v4461_v9  ;;  %v4518_v40 = vld [vmem:[#allocation9 + $0x3d0] ss:$8 sps:$4 sm:$0xff]   ;;  %v4526_v51 = vld [vmem:[#allocation9 + $0x3c4] ss:$8 sps:$4 sm:$0xff]   ;;  %v4509_v4 = vld [vmem:[#allocation9 + $0x2e0] ss:$8 sps:$4 sm:$0xff]  }
 0x1ab   :  { %1517 = vmatprep.subr.bf16.mxu1 %v4469_v13  ;;  %v5291_v19 = vrot.slane %v1637_v31, %v5265_v27  ;;  %v4517_v44 = vld [vmem:[#allocation9 + $0x2d4] ss:$8 sps:$4 sm:$0xff]   ;;  %v4524_v55 = vld [vmem:[#allocation9 + $0x3c0] ss:$8 sps:$4 sm:$0xff]   ;;  %v4515_v38 = vld [vmem:[#allocation9 + $0x2d0] ss:$8 sps:$4 sm:$0xff]  }
 0x1ac   :  { %1815 = vmatpush1.bf16.msra.mxu0 %v4476_v15  ;;  %v4532_v5 = vld [vmem:[#allocation9 + $0x3b4] ss:$8 sps:$4 sm:$0xff]   ;;  %v4523_v6 = vld [vmem:[#allocation9 + $0x2c4] ss:$8 sps:$4 sm:$0xff]   ;;  %v4530_v56 = vld [vmem:[#allocation9 + $0x3b0] ss:$8 sps:$4 sm:$0xff]  }
 0x1ad   :  { %v1645_v23 = vcombine.high %v5291_v19, %v5291_v19  ;;  %1816 = vmatprep.subr.bf16.mxu0 %v4484_v16  ;;  %v4538_v58 = vld [vmem:[#allocation9 + $0x3a4] ss:$8 sps:$4 sm:$0xff]   ;;  %v4521_v57 = vld [vmem:[#allocation9 + $0x2c0] ss:$8 sps:$4 sm:$0xff]   ;;  %v4529_v52 = vld [vmem:[#allocation9 + $0x2b4] ss:$8 sps:$4 sm:$0xff]  }
 0x1ae   :  { %1518 = vmatpush1.bf16.msra.mxu1 %v4467_v17  ;;  %v4102_v60 = vld.sshfl [vmem:[#allocation2] sm:$0x5a pattern:$0x76325410]  ;;  %v4544_v7 = vld [vmem:[#allocation9 + $0x394] ss:$8 sps:$4 sm:$0xff]   ;;  %vm5358_vm15 = vmand %vm2421_vm12, %vm2422_vm7 }
 0x1af   :  { %1840 = vmatprep.mubr.bf16.mxu0 %v1645_v23  ;;  %1519 = vmatprep.subr.bf16.mxu1 %v4475_v20  ;;  %v4103_v39 = vld.sshfl [vmem:[#allocation2 + $0x8] sm:$0x5a pattern:$0x76325410]  ;;  %v4536_v61 = vld [vmem:[#allocation9 + $0x3a0] ss:$8 sps:$4 sm:$0xff]   ;;  %v1862_v53 = vcombine.high %v4102_v60, %v4102_v60 }
 0x1b0   :  { %1817 = vmatpush1.bf16.msra.mxu0 %v4482_v22  ;;  %v1870_v21 = vcombine.high %v4103_v39, %v4103_v39  ;;  %v4527_v42 = vld [vmem:[#allocation9 + $0x2b0] ss:$8 sps:$4 sm:$0xff]   ;;  %v4535_v47 = vld [vmem:[#allocation9 + $0x2a4] ss:$8 sps:$4 sm:$0xff]   ;;  %v4533_v13 = vld [vmem:[#allocation9 + $0x2a0] ss:$8 sps:$4 sm:$0xff]  }
 0x1b1   :  { %1818 = vmatprep.subr.bf16.mxu0 %v4490_v24  ;;  %v4542_v9 = vld [vmem:[#allocation9 + $0x390] ss:$8 sps:$4 sm:$0xff]   ;;  %v4550_v10 = vld [vmem:[#allocation9 + $0x384] ss:$8 sps:$4 sm:$0xff]   ;;  %v1876_v11 = vrot.slane %v1862_v53, 7  ;;  %v4104_v15 = vrot.slane %v4102_v60, 9 }
 0x1b2   :  { %1520 = vmatpush1.bf16.msra.mxu1 %v4473_v25  ;;  %v1880_v12 = vrot.slane %v1870_v21, 7  ;;  %v4541_v14 = vld [vmem:[#allocation9 + $0x294] ss:$8 sps:$4 sm:$0xff]   ;;  %v4105_v31 = vrot.slane %v4103_v39, 9  ;;  %v4548_v16 = vld [vmem:[#allocation9 + $0x380] ss:$8 sps:$4 sm:$0xff]  }
 0x1b3   :  { %1521 = vmatprep.subr.bf16.mxu1 %v4481_v26  ;;  %v1877_v17 = vsel %vm1873_vm0, %v4104_v15, %v1876_v11  ;;  %v4539_v22 = vld [vmem:[#allocation9 + $0x290] ss:$8 sps:$4 sm:$0xff]   ;;  %v4547_v23 = vld [vmem:[#allocation9 + $0x284] ss:$8 sps:$4 sm:$0xff]   ;;  %v4545_v25 = vld [vmem:[#allocation9 + $0x280] ss:$8 sps:$4 sm:$0xff]  }
 0x1b4   :  { %1819 = vmatpush1.bf16.msra.mxu0 %v4488_v28  ;;  %v1881_v20 = vsel %vm1873_vm0, %v4105_v31, %v1880_v12  ;;  %v4553_v26 = vld [vmem:[#allocation9 + $0x474] ss:$8 sps:$4 sm:$0xff]   ;;  %v4596_v60 = vld [vmem:[#allocation9 + $0x480] ss:$8 sps:$4 sm:$0xff]   ;;  %v176_v11 = vld [vmem:[#allocation3 + $0x4] sm:$0x5] }
 0x1b5   :  { %1820 = vmatprep.subr.bf16.mxu0 %v4496_v29  ;;  %v1915_v24 = vcombine.low %v1877_v17, %v1881_v20  ;;  %v4551_v29 = vld [vmem:[#allocation9 + $0x470] ss:$8 sps:$4 sm:$0xff]   ;;  %v4604_v31 = vld [vmem:[#allocation10 + $0x164] ss:$8 sps:$4 sm:$0xff]   ;;  %v4602_v17 = vld [vmem:[#allocation10 + $0x160] ss:$8 sps:$4 sm:$0xff]  }
 0x1b6   :  { %1522 = vmatpush1.bf16.msra.mxu1 %v4479_v30  ;;  %v4556_v30 = vld [vmem:[#allocation9 + $0x464] ss:$8 sps:$4 sm:$0xff]   ;;  %v4599_v15 = vld [vmem:[#allocation10 + $0x170] ss:$8 sps:$4 sm:$0xff]   ;;  %vm2419_vm4 = vsmask.f32 1282 }
 0x1b7   :  { %1523 = vmatprep.subr.bf16.mxu1 %v4487_v32  ;;  %v5301_v28 = vrot.slane %v1915_v24, %v5265_v27  ;;  %v4605_v20 = vld [vmem:[#allocation10 + $0x70] ss:$8 sps:$4 sm:$0xff]   ;;  %v4611_v24 = vld [vmem:[#allocation10 + $0x60] ss:$8 sps:$4 sm:$0xff]   ;;  %vm3004_vm13 = vsmask.f32 1284  ;;  %vm5352_vm3 = vmand %vm2418_vm11, %vm2419_vm4 }
 0x1b8   :  { %1821 = vmatpush1.bf16.msra.mxu0 %v4494_v34  ;;  %v4554_v34 = vld [vmem:[#allocation9 + $0x460] ss:$8 sps:$4 sm:$0xff]   ;;  %vm3005_vm9 = vmor %vm132_vm1, %vm3004_vm13  ;;  %vm3008_vm2 = vsmask.f32 3340  ;;  %vm3010_vm6 = vsmask.f32 4368 }
 0x1b9   :  { %1822 = vmatprep.subr.bf16.mxu0 %v4502_v35  ;;  %v1923_v32 = vcombine.high %v5301_v28, %v5301_v28  ;;  %v4559_v35 = vld [vmem:[#allocation9 + $0x454] ss:$8 sps:$4 sm:$0xff]   ;;  %vm2424_vm0 = vmor %vm5358_vm15, %vm5352_vm3  ;;  %vm3012_vm4 = vsmask.f32 5396  ;;  %vm3014_vm7 = vsmask.f32 6424 }
 0x1ba   :  { %1524 = vmatpush1.bf16.msra.mxu1 %v4485_v36  ;;  %v4562_v36 = vld [vmem:[#allocation9 + $0x444] ss:$8 sps:$4 sm:$0xff]   ;;  %vm3007_vm1 = vmor %vm3005_vm9, %vm3006_vm8  ;;  %vm3016_vm3 = vsmask.f32 7452  ;;  %vm3297_vm8 = vcmask 1043456  }
 0x1bb   :  { %1525 = vmatprep.subr.bf16.mxu1 %v4493_v37  ;;  %v4560_v37 = vld [vmem:[#allocation9 + $0x440] ss:$8 sps:$4 sm:$0xff]  }
 0x1bc   :  { %1823 = vmatpush1.bf16.msra.mxu0 %v4500_v45  ;;  %v4565_v45 = vld [vmem:[#allocation9 + $0x434] ss:$8 sps:$4 sm:$0xff]  }
 0x1bd   :  { %1824 = vmatprep.subr.bf16.mxu0 %v4508_v46  ;;  %v4563_v46 = vld [vmem:[#allocation9 + $0x430] ss:$8 sps:$4 sm:$0xff]  }
 0x1be   :  { %1526 = vmatpush1.bf16.msra.mxu1 %v4491_v62  ;;  %v4568_v62 = vld [vmem:[#allocation9 + $0x424] ss:$8 sps:$4 sm:$0xff]  }
 0x1bf   :  { %1527 = vmatprep.subr.bf16.mxu1 %v4499_v63  ;;  %v4566_v63 = vld [vmem:[#allocation9 + $0x420] ss:$8 sps:$4 sm:$0xff]  }
 0x1c0   :  { %1825 = vmatpush2.bf16.msra.mxu0 %v4506_v0  ;;  %v4569_v0 = vld [vmem:[#allocation9 + $0x410] ss:$8 sps:$4 sm:$0xff]  }
 0x1c1   :  { %1826 = vmatprep.subr.bf16.mxu0 %v4514_v48  ;;  %v4574_v48 = vld [vmem:[#allocation9 + $0x404] ss:$8 sps:$4 sm:$0xff]  }
 0x1c2   :  { %1528 = vmatpush1.bf16.msra.mxu1 %v4497_v50  ;;  %v4572_v50 = vld [vmem:[#allocation9 + $0x400] ss:$8 sps:$4 sm:$0xff]  }
 0x1c3   :  { %1529 = vmatprep.subr.bf16.mxu1 %v4505_v49  ;;  %v4577_v49 = vld [vmem:[#allocation9 + $0x4f4] ss:$8 sps:$4 sm:$0xff]  }
 0x1c4   :  { %1827 = vmatpush2.bf16.msra.mxu0 %v4512_v54  ;;  %v4575_v54 = vld [vmem:[#allocation9 + $0x4f0] ss:$8 sps:$4 sm:$0xff]  }
 0x1c5   :  { %1828 = vmatprep.subr.bf16.mxu0 %v4520_v1  ;;  %v4580_v1 = vld [vmem:[#allocation9 + $0x4e4] ss:$8 sps:$4 sm:$0xff]  }
 0x1c6   :  { %1530 = vmatpush2.bf16.msra.mxu1 %v4503_v2  ;;  %v4578_v2 = vld [vmem:[#allocation9 + $0x4e0] ss:$8 sps:$4 sm:$0xff]  }
 0x1c7   :  { %1531 = vmatprep.subr.bf16.mxu1 %v4511_v3  ;;  %v4583_v3 = vld [vmem:[#allocation9 + $0x4d4] ss:$8 sps:$4 sm:$0xff]  }
 0x1c8   :  { %1829 = vmatpush2.bf16.msra.mxu0 %v4518_v40  ;;  %v4581_v40 = vld [vmem:[#allocation9 + $0x4d0] ss:$8 sps:$4 sm:$0xff]  }
 0x1c9   :  { %1830 = vmatprep.subr.bf16.mxu0 %v4526_v51  ;;  %v4586_v51 = vld [vmem:[#allocation9 + $0x4c4] ss:$8 sps:$4 sm:$0xff]  }
 0x1ca   :  { %1532 = vmatpush2.bf16.msra.mxu1 %v4509_v4  ;;  %v4584_v4 = vld [vmem:[#allocation9 + $0x4c0] ss:$8 sps:$4 sm:$0xff]  }
 0x1cb   :  { %1533 = vmatprep.subr.bf16.mxu1 %v4517_v44  ;;  %v4589_v44 = vld [vmem:[#allocation9 + $0x4b4] ss:$8 sps:$4 sm:$0xff]  }
 0x1cc   :  { %1831 = vmatpush2.bf16.msra.mxu0 %v4524_v55  ;;  %v4587_v55 = vld [vmem:[#allocation9 + $0x4b0] ss:$8 sps:$4 sm:$0xff]  }
 0x1cd   :  { %1832 = vmatprep.subr.bf16.mxu0 %v4532_v5  ;;  %v4592_v5 = vld [vmem:[#allocation9 + $0x4a4] ss:$8 sps:$4 sm:$0xff]  }
 0x1ce   :  { %1534 = vmatpush2.bf16.msra.mxu1 %v4515_v38  ;;  %v4590_v38 = vld [vmem:[#allocation9 + $0x4a0] ss:$8 sps:$4 sm:$0xff]  }
 0x1cf   :  { %1535 = vmatprep.subr.bf16.mxu1 %v4523_v6  ;;  %v4595_v6 = vld [vmem:[#allocation9 + $0x494] ss:$8 sps:$4 sm:$0xff]  }
 0x1d0   :  { %1833 = vmatpush2.bf16.msra.mxu0 %v4530_v56  ;;  %v4593_v56 = vld [vmem:[#allocation9 + $0x490] ss:$8 sps:$4 sm:$0xff]  }
 0x1d1   :  { %1834 = vmatprep.subr.bf16.mxu0 %v4538_v58  ;;  %v4598_v58 = vld [vmem:[#allocation9 + $0x484] ss:$8 sps:$4 sm:$0xff]  }
 0x1d2   :  { %1536 = vmatpush2.bf16.msra.mxu1 %v4521_v57 }
 0x1d3   :  { %1537 = vmatprep.subr.bf16.mxu1 %v4529_v52 }
 0x1d4   :  { %1835 = vmatpush2.bf16.msra.mxu0 %v4536_v61 }
 0x1d5   :  { %1836 = vmatprep.subr.bf16.mxu0 %v4544_v7 }
 0x1d6   :  { %1538 = vmatpush2.bf16.msra.mxu1 %v4527_v42 }
 0x1d7   :  { %1539 = vmatprep.subr.bf16.mxu1 %v4535_v47 }
 0x1d8   :  { %1837 = vmatpush2.bf16.msra.mxu0 %v4542_v9 }
 0x1d9   :  { %1838 = vmatprep.subr.bf16.mxu0 %v4550_v10  ;;  %v173_v10 = vld [vmem:[#allocation3] sm:$0x5] }
 0x1da   :  { %1540 = vmatpush2.bf16.msra.mxu1 %v4533_v13  ;;  %v174_v12 = vsel %vm172_vm10, 0, %v173_v10  ;;  %v177_v13 = vsel %vm172_vm10, 0, %v176_v11  ;;  %v4667_v10 = vld [vmem:[#allocation10 + $0xd4] ss:$8 sps:$4 sm:$0xff]   ;;  %v4662_v11 = vld [vmem:[#allocation10 + $0x1c0] ss:$8 sps:$4 sm:$0xff]  }
 0x1db   :  { %1541 = vmatprep.subr.bf16.mxu1 %v4541_v14  ;;  %175 = vst [vmem:[#allocation3] sm:$0x5] %v174_v12  ;;  %178 = vst [vmem:[#allocation3 + $0x4] sm:$0x5] %v177_v13  ;;  %v4601_v14 = vld [vmem:[#allocation10 + $0x174] ss:$8 sps:$4 sm:$0xff]  }
 0x1dc   :  { %1839 = vmatpush2.bf16.msra.mxu0 %v4548_v16  ;;  %v4607_v16 = vld [vmem:[#allocation10 + $0x74] ss:$8 sps:$4 sm:$0xff]   ;;  %v4665_v12 = vld [vmem:[#allocation10 + $0xd0] ss:$8 sps:$4 sm:$0xff]  }
 0x1dd   :  { %2717 = vmatprep.subr.bf16.mxu0 %v4601_v14  ;;  %v4670_v13 = vld [vmem:[#allocation10 + $0x1b4] ss:$8 sps:$4 sm:$0xff]   ;;  %v4673_v14 = vld [vmem:[#allocation10 + $0xc4] ss:$8 sps:$4 sm:$0xff]  }
 0x1de   :  { %1542 = vmatpush2.bf16.msra.mxu1 %v4539_v22  ;;  %v4610_v22 = vld [vmem:[#allocation10 + $0x154] ss:$8 sps:$4 sm:$0xff]  }
 0x1df   :  { %1543 = vmatprep.subr.bf16.mxu1 %v4547_v23  ;;  %1841 = vmatmul.mubr.bf16.vlgmr.msra.gmra.mxu0 %v5291_v19  ;;  %v4557_v19 = vld [vmem:[#allocation9 + $0x450] ss:$8 sps:$4 sm:$0xff]   ;;  %v4613_v23 = vld [vmem:[#allocation10 + $0x64] ss:$8 sps:$4 sm:$0xff]  }
 0x1e0   :  { %2718 = vmatpush1.bf16.msra.mxu0 %v4599_v15  ;;  %v4668_v15 = vld [vmem:[#allocation10 + $0x1b0] ss:$8 sps:$4 sm:$0xff]  }
 0x1e1   :  { %2719 = vmatprep.subr.bf16.mxu0 %v4604_v31  ;;  %v4671_v31 = vld [vmem:[#allocation10 + $0xc0] ss:$8 sps:$4 sm:$0xff]  }
 0x1e2   :  { %1544 = vmatpush2.bf16.msra.mxu1 %v4545_v25  ;;  %v4616_v25 = vld [vmem:[#allocation10 + $0x144] ss:$8 sps:$4 sm:$0xff]  }
 0x1e3   :  { %2086 = vmatprep.subr.bf16.mxu1 %v4553_v26  ;;  %v4619_v26 = vld [vmem:[#allocation10 + $0x54] ss:$8 sps:$4 sm:$0xff]  }
 0x1e4   :  { %2720 = vmatpush1.bf16.msra.mxu0 %v4602_v17  ;;  %v4679_v17 = vld [vmem:[#allocation10 + $0xb4] ss:$8 sps:$4 sm:$0xff]  }
 0x1e5   :  { %1546 = vmatmul.mubr.bf16.vlgmr.msra.gmra.mxu1 %v5282_v59  ;;  %v4571_v59 = vld [vmem:[#allocation9 + $0x414] ss:$8 sps:$4 sm:$0xff]   ;;  %2721 = vmatprep.subr.bf16.mxu0 %v4610_v22  ;;  %v4677_v22 = vld [vmem:[#allocation10 + $0xb0] ss:$8 sps:$4 sm:$0xff]  }
 0x1e6   :  { %2087 = vmatpush1.bf16.msra.mxu1 %v4551_v29  ;;  %2118 = vmatprep.mubr.bf16.mxu1 %v1923_v32  ;;  %v4617_v29 = vld [vmem:[#allocation10 + $0x50] ss:$8 sps:$4 sm:$0xff]   ;;  %v4625_v32 = vld [vmem:[#allocation10 + $0x44] ss:$8 sps:$4 sm:$0xff]  }
 0x1e7   :  { %2088 = vmatprep.subr.bf16.mxu1 %v4556_v30  ;;  %v4622_v30 = vld [vmem:[#allocation10 + $0x134] ss:$8 sps:$4 sm:$0xff]  }
 0x1e8   :  { %2722 = vmatpush1.bf16.msra.mxu0 %v4608_v18  ;;  %v4685_v18 = vld [vmem:[#allocation10 + $0xa4] ss:$8 sps:$4 sm:$0xff]  }
 0x1e9   :  { %2723 = vmatprep.subr.bf16.mxu0 %v4616_v25  ;;  %v4683_v25 = vld [vmem:[#allocation10 + $0xa0] ss:$8 sps:$4 sm:$0xff]  }
 0x1ea   :  { %2089 = vmatpush1.bf16.msra.mxu1 %v4554_v34  ;;  %v4620_v34 = vld [vmem:[#allocation10 + $0x130] ss:$8 sps:$4 sm:$0xff]  }
 0x1eb   :  { %2090 = vmatprep.subr.bf16.mxu1 %v4559_v35  ;;  %v4623_v35 = vld [vmem:[#allocation10 + $0x40] ss:$8 sps:$4 sm:$0xff]  }
 0x1ee   :  { %2091 = vmatpush1.bf16.msra.mxu1 %v4557_v19 }
 0x1ef   :  { %2092 = vmatprep.subr.bf16.mxu1 %v4562_v36 }
 0x1f2   :  { %2093 = vmatpush1.bf16.msra.mxu1 %v4560_v37  ;;  %v4628_v37 = vld [vmem:[#allocation10 + $0x124] ss:$8 sps:$4 sm:$0xff]  }
 0x1f3   :  { %2094 = vmatprep.subr.bf16.mxu1 %v4565_v45  ;;  %v4631_v45 = vld [vmem:[#allocation10 + $0x34] ss:$8 sps:$4 sm:$0xff]  }
 0x1f6   :  { %2095 = vmatpush1.bf16.msra.mxu1 %v4563_v46  ;;  %v4626_v46 = vld [vmem:[#allocation10 + $0x120] ss:$8 sps:$4 sm:$0xff]  }
 0x1f7   :  { %2096 = vmatprep.subr.bf16.mxu1 %v4568_v62  ;;  %v4629_v62 = vld [vmem:[#allocation10 + $0x30] ss:$8 sps:$4 sm:$0xff]  }
 0x1fa   :  { %2097 = vmatpush1.bf16.msra.mxu1 %v4566_v63 }
 0x1fb   :  { %2098 = vmatprep.subr.bf16.mxu1 %v4571_v59 }
 0x1fe   :  { %2099 = vmatpush1.bf16.msra.mxu1 %v4569_v0 }
 0x1ff   :  { %2100 = vmatprep.subr.bf16.mxu1 %v4574_v48  ;;  %v4634_v48 = vld [vmem:[#allocation10 + $0x114] ss:$8 sps:$4 sm:$0xff]  }
 0x202   :  { %2101 = vmatpush1.bf16.msra.mxu1 %v4572_v50  ;;  %v4637_v50 = vld [vmem:[#allocation10 + $0x24] ss:$8 sps:$4 sm:$0xff]  }
 0x203   :  { %2102 = vmatprep.subr.bf16.mxu1 %v4577_v49 }
 0x206   :  { %2103 = vmatpush2.bf16.msra.mxu1 %v4575_v54  ;;  %v4632_v54 = vld [vmem:[#allocation10 + $0x110] ss:$8 sps:$4 sm:$0xff]  }
 0x207   :  { %2104 = vmatprep.subr.bf16.mxu1 %v4580_v1  ;;  %v4635_v1 = vld [vmem:[#allocation10 + $0x20] ss:$8 sps:$4 sm:$0xff]  }
 0x20a   :  { %2105 = vmatpush2.bf16.msra.mxu1 %v4578_v2 }
 0x20b   :  { %2106 = vmatprep.subr.bf16.mxu1 %v4583_v3 }
 0x20e   :  { %2107 = vmatpush2.bf16.msra.mxu1 %v4581_v40 }
 0x20f   :  { %2108 = vmatprep.subr.bf16.mxu1 %v4586_v51 }
 0x212   :  { %2109 = vmatpush2.bf16.msra.mxu1 %v4584_v4  ;;  %v4640_v4 = vld [vmem:[#allocation10 + $0x104] ss:$8 sps:$4 sm:$0xff]  }
 0x213   :  { %2110 = vmatprep.subr.bf16.mxu1 %v4589_v44  ;;  %v4643_v44 = vld [vmem:[#allocation10 + $0x14] ss:$8 sps:$4 sm:$0xff]  }
 0x216   :  { %2111 = vmatpush2.bf16.msra.mxu1 %v4587_v55 }
 0x217   :  { %2112 = vmatprep.subr.bf16.mxu1 %v4592_v5  ;;  %v4638_v5 = vld [vmem:[#allocation10 + $0x100] ss:$8 sps:$4 sm:$0xff]  }
 0x21a   :  { %2113 = vmatpush2.bf16.msra.mxu1 %v4590_v38  ;;  %v4641_v38 = vld [vmem:[#allocation10 + $0x10] ss:$8 sps:$4 sm:$0xff]  }
 0x21b   :  { %2114 = vmatprep.subr.bf16.mxu1 %v4595_v6 }
 0x21e   :  { %2115 = vmatpush2.bf16.msra.mxu1 %v4593_v56  ;;  %v4646_v56 = vld [vmem:[#allocation10 + $0x1f4] ss:$8 sps:$4 sm:$0xff]  }
 0x21f   :  { %2116 = vmatprep.subr.bf16.mxu1 %v4598_v58  ;;  %v4649_v58 = vld [vmem:[#allocation10 + $0x4] ss:$8 sps:$4 sm:$0xff]  }
 0x222   :  { %2117 = vmatpush2.bf16.msra.mxu1 %v4596_v60  ;;  %v4644_v60 = vld [vmem:[#allocation10 + $0x1f0] ss:$8 sps:$4 sm:$0xff]  }
 0x223   :  { %2943 = vmatprep.subr.bf16.mxu1 %v4607_v16  ;;  %v4676_v16 = vld [vmem:[#allocation10 + $0x1a4] ss:$8 sps:$4 sm:$0xff]  }
 0x225   :  { %2119 = vmatmul.mubr.bf16.vlgmr.msra.gmra.mxu1 %v5301_v28  ;;  %v4614_v28 = vld [vmem:[#allocation10 + $0x140] ss:$8 sps:$4 sm:$0xff]  }
 0x226   :  { %2944 = vmatpush1.bf16.msra.mxu1 %v4605_v20  ;;  %2724 = vmatpush1.bf16.msra.mxu0 %v4614_v28  ;;  %v4674_v20 = vld [vmem:[#allocation10 + $0x1a0] ss:$8 sps:$4 sm:$0xff]   ;;  %v4691_v28 = vld [vmem:[#allocation10 + $0x94] ss:$8 sps:$4 sm:$0xff]  }
 0x227   :  { %2945 = vmatprep.subr.bf16.mxu1 %v4613_v23  ;;  %2725 = vmatprep.subr.bf16.mxu0 %v4622_v30  ;;  %v4682_v23 = vld [vmem:[#allocation10 + $0x194] ss:$8 sps:$4 sm:$0xff]   ;;  %v4689_v30 = vld [vmem:[#allocation10 + $0x90] ss:$8 sps:$4 sm:$0xff]  }
 0x22a   :  { %2946 = vmatpush1.bf16.msra.mxu1 %v4611_v24  ;;  %2726 = vmatpush1.bf16.msra.mxu0 %v4620_v34  ;;  %v4680_v24 = vld [vmem:[#allocation10 + $0x190] ss:$8 sps:$4 sm:$0xff]   ;;  %v4697_v34 = vld [vmem:[#allocation10 + $0x274] ss:$8 sps:$4 sm:$0xff]  }
 0x22b   :  { %2947 = vmatprep.subr.bf16.mxu1 %v4619_v26  ;;  %2727 = vmatprep.subr.bf16.mxu0 %v4628_v37  ;;  %v4688_v26 = vld [vmem:[#allocation10 + $0x184] ss:$8 sps:$4 sm:$0xff]  }
 0x22e   :  { %2948 = vmatpush1.bf16.msra.mxu1 %v4617_v29  ;;  %2728 = vmatpush1.bf16.msra.mxu0 %v4626_v46  ;;  %v4686_v29 = vld [vmem:[#allocation10 + $0x180] ss:$8 sps:$4 sm:$0xff]  }
 0x22f   :  { %2949 = vmatprep.subr.bf16.mxu1 %v4625_v32  ;;  %2729 = vmatprep.subr.bf16.mxu0 %v4634_v48  ;;  %v4694_v32 = vld [vmem:[#allocation10 + $0x84] ss:$8 sps:$4 sm:$0xff]  }
 0x232   :  { %2950 = vmatpush1.bf16.msra.mxu1 %v4623_v35  ;;  %2730 = vmatpush1.bf16.msra.mxu0 %v4632_v54  ;;  %v4692_v35 = vld [vmem:[#allocation10 + $0x80] ss:$8 sps:$4 sm:$0xff]  }
 0x233   :  { %2951 = vmatprep.subr.bf16.mxu1 %v4631_v45  ;;  %2731 = vmatprep.subr.bf16.mxu0 %v4640_v4 }
 0x236   :  { %2952 = vmatpush1.bf16.msra.mxu1 %v4629_v62  ;;  %2732 = vmatpush1.bf16.msra.mxu0 %v4638_v5 }
 0x237   :  { %2953 = vmatprep.subr.bf16.mxu1 %v4637_v50  ;;  %2733 = vmatprep.subr.bf16.mxu0 %v4646_v56 }
 0x23a   :  { %2954 = vmatpush1.bf16.msra.mxu1 %v4635_v1  ;;  %2734 = vmatpush2.bf16.msra.mxu0 %v4644_v60 }
 0x23b   :  { %2955 = vmatprep.subr.bf16.mxu1 %v4643_v44 }
 0x23e   :  { %2956 = vmatpush1.bf16.msra.mxu1 %v4641_v38 }
 0x23f   :  { %2957 = vmatprep.subr.bf16.mxu1 %v4649_v58 }
 0x25e   :  { %v1248_v57 = vpop.f32.mrf.mxu0 }
 0x260   :  { %v1250_v39 = vpop.f32.mrf.mxu0 }
 0x262   :  { %v1252_v52 = vpop.f32.mrf.mxu0 }
 0x263   :  { %v4655_v52 = vld [vmem:[#allocation10 + $0xf4] ss:$8 sps:$4 sm:$0xff]  }
 0x264   :  { %v1253_v61 = vpop.f32.mrf.mxu0 }
 0x265   :  { %v1036_v7 = vpop.f32.mrf.mxu1  ;;  %v4650_v61 = vld [vmem:[#allocation10 + $0x1e0] ss:$8 sps:$4 sm:$0xff]  }
 0x266   :  { %v5307_v53 = vadd.f32 %v1248_v57, %v1036_v7  ;;  %v4647_v57 = vld [vmem:[#allocation10] ss:$8 sps:$4 sm:$0xff]   ;;  %v4653_v7 = vld [vmem:[#allocation10 + $0xf0] ss:$8 sps:$4 sm:$0xff]  }
 0x267   :  { %v1038_v21 = vpop.f32.mrf.mxu1  ;;  %2958 = vmatpush1.bf16.msra.mxu1 %v4647_v57 }
 0x268   :  { %v5309_v42 = vadd.f32 %v1250_v39, %v1038_v21  ;;  %v4652_v39 = vld [vmem:[#allocation10 + $0x1e4] ss:$8 sps:$4 sm:$0xff]   ;;  %2959 = vmatprep.subr.bf16.mxu1 %v4655_v52 }
 0x269   :  { %v1040_v47 = vpop.f32.mrf.mxu1  ;;  %2735 = vmatprep.subr.bf16.mxu0 %v4652_v39  ;;  %v4661_v21 = vld [vmem:[#allocation10 + $0xe4] ss:$8 sps:$4 sm:$0xff]  }
 0x26a   :  { %2736 = vmatpush2.bf16.msra.mxu0 %v4650_v61  ;;  %v4659_v47 = vld [vmem:[#allocation10 + $0xe0] ss:$8 sps:$4 sm:$0xff]  }
 0x26b   :  { %v1041_v9 = vpop.f32.mrf.mxu1  ;;  %2960 = vmatpush2.bf16.msra.mxu1 %v4653_v7 }
 0x26c   :  { %2961 = vmatprep.subr.bf16.mxu1 %v4661_v21  ;;  %v4664_v9 = vld [vmem:[#allocation10 + $0x1c4] ss:$8 sps:$4 sm:$0xff]  }
 0x26f   :  { %2962 = vmatpush2.bf16.msra.mxu1 %v4659_v47 }
 0x270   :  { %2963 = vmatprep.subr.bf16.mxu1 %v4667_v10 }
 0x273   :  { %2964 = vmatpush2.bf16.msra.mxu1 %v4665_v12 }
 0x274   :  { %2965 = vmatprep.subr.bf16.mxu1 %v4673_v14 }
 0x277   :  { %2966 = vmatpush2.bf16.msra.mxu1 %v4671_v31 }
 0x278   :  { %2967 = vmatprep.subr.bf16.mxu1 %v4679_v17 }
 0x27b   :  { %2968 = vmatpush2.bf16.msra.mxu1 %v4677_v22 }
 0x27c   :  { %2969 = vmatprep.subr.bf16.mxu1 %v4685_v18 }
 0x27f   :  { %2970 = vmatpush2.bf16.msra.mxu1 %v4683_v25 }
 0x280   :  { %2971 = vmatprep.subr.bf16.mxu1 %v4691_v28 }
 0x283   :  { %2972 = vmatpush2.bf16.msra.mxu1 %v4689_v30 }
 0x284   :  { %2973 = vmatprep.subr.bf16.mxu1 %v4694_v32 }
 0x287   :  { %2974 = vmatpush2.bf16.msra.mxu1 %v4692_v35 }
 0x29f   :  { %v1842_v19 = vpop.f32.mrf.mxu0 }
 0x2a1   :  { %v1844_v36 = vpop.f32.mrf.mxu0 }
 0x2a3   :  { %v1846_v63 = vpop.f32.mrf.mxu0 }
 0x2a5   :  { %v1547_v59 = vpop.f32.mrf.mxu1  ;;  %v1847_v0 = vpop.f32.mrf.mxu0 }
 0x2a6   :  { %v1554_v49 = vadd.f32 %v1547_v59, %v5307_v53  ;;  %v4658_v53 = vld [vmem:[#allocation10 + $0x1d4] ss:$8 sps:$4 sm:$0xff]  }
 0x2a7   :  { %v1549_v2 = vpop.f32.mrf.mxu1  ;;  %2737 = vmatprep.subr.bf16.mxu0 %v4658_v53 }
 0x2a8   :  { %v5315_v3 = vadd.f32 %v1842_v19, %v1554_v49  ;;  %v1555_v40 = vadd.f32 %v1549_v2, %v5309_v42  ;;  %v4656_v42 = vld [vmem:[#allocation10 + $0x1d0] ss:$8 sps:$4 sm:$0xff]  }
 0x2a9   :  { %v1551_v51 = vpop.f32.mrf.mxu1  ;;  %2738 = vmatpush2.bf16.msra.mxu0 %v4656_v42 }
 0x2aa   :  { %v5318_v55 = vadd.f32 %v1844_v36, %v1555_v40  ;;  %2739 = vmatprep.subr.bf16.mxu0 %v4664_v9 }
 0x2ab   :  { %v1552_v6 = vpop.f32.mrf.mxu1 }
 0x2ad   :  { %2740 = vmatpush2.bf16.msra.mxu0 %v4662_v11 }
 0x2ae   :  { %2741 = vmatprep.subr.bf16.mxu0 %v4670_v13 }
 0x2b1   :  { %2742 = vmatpush2.bf16.msra.mxu0 %v4668_v15 }
 0x2b2   :  { %2743 = vmatprep.subr.bf16.mxu0 %v4676_v16 }
 0x2b5   :  { %2744 = vmatpush2.bf16.msra.mxu0 %v4674_v20 }
 0x2b6   :  { %2745 = vmatprep.subr.bf16.mxu0 %v4682_v23  ;;  %v2165_v23 = vld [vmem:[%s5439_s5] sm:$0x3] }
 0x2b9   :  { %2746 = vmatpush2.bf16.msra.mxu0 %v4680_v24 }
 0x2ba   :  { %2747 = vmatprep.subr.bf16.mxu0 %v4688_v26 }
 0x2bd   :  { %2748 = vmatpush2.bf16.msra.mxu0 %v4686_v29 }
 0x2be   :  { %3254 = vmatprep.subr.bf16.mxu0 %v4697_v34 }
 0x2e5   :  { %v2120_v19 = vpop.f32.mrf.mxu1 }
 0x2e6   :  { %v2127_v36 = vadd.f32 %v2120_v19, %v5315_v3  ;;  %v2189_v19 = vld [vmem:[%s5440_s6] sm:$0x3] }
 0x2e7   :  { %v2122_v37 = vpop.f32.mrf.mxu1 }
 0x2e8   :  { %v2129_v45 = vrot.slane %v2127_v36, 4  ;;  %v2141_v46 = vmul.f32 %v2127_v36, %v2127_v36  ;;  %v2128_v62 = vadd.f32 %v2122_v37, %v5318_v55 }
 0x2e9   :  { %v2124_v63 = vpop.f32.mrf.mxu1 }
 0x2ea   :  { %v2130_v59 = vadd.f32 %v2129_v45, %v2127_v36  ;;  %v2143_v0 = vrot.slane %v2141_v46, 4  ;;  %v2135_v48 = vrot.slane %v2128_v62, 4  ;;  %v2142_v50 = vmul.f32 %v2128_v62, %v2128_v62 }
 0x2eb   :  { %v2125_v49 = vpop.f32.mrf.mxu1 }
 0x2ec   :  { %v2131_v54 = vrot.slane %v2130_v59, 2  ;;  %v2144_v1 = vadd.f32 %v2143_v0, %v2141_v46  ;;  %v2136_v2 = vadd.f32 %v2135_v48, %v2128_v62  ;;  %v2149_v40 = vrot.slane %v2142_v50, 4 }
 0x2ee   :  { %v2132_v51 = vadd.f32 %v2131_v54, %v2130_v59  ;;  %v2145_v4 = vrot.slane %v2144_v1, 2  ;;  %v2137_v44 = vrot.slane %v2136_v2, 2  ;;  %v2150_v5 = vadd.f32 %v2149_v40, %v2142_v50 }
 0x2f0   :  { %v2133_v3 = vrot.slane %v2132_v51, 1  ;;  %v2146_v38 = vadd.f32 %v2145_v4, %v2144_v1  ;;  %v2138_v6 = vadd.f32 %v2137_v44, %v2136_v2  ;;  %v2151_v56 = vrot.slane %v2150_v5, 2 }
 0x2f2   :  { %v2134_v58 = vadd.f32 %v2133_v3, %v2132_v51  ;;  %v2147_v55 = vrot.slane %v2146_v38, 1  ;;  %v2139_v60 = vrot.slane %v2138_v6, 1  ;;  %v2152_v57 = vadd.f32 %v2151_v56, %v2150_v5 }
 0x2f4   :  { %v2148_v39 = vadd.f32 %v2147_v55, %v2146_v38  ;;  %v2155_v52 = vmul.f32 0.125, %v2134_v58  ;;  %v2140_v61 = vadd.f32 %v2139_v60, %v2138_v6  ;;  %v2153_v7 = vrot.slane %v2152_v57, 1 }
 0x2f6   :  { %v2157_v53 = vmul.f32 0.125, %v2148_v39  ;;  %v2159_v21 = vmul.f32 %v2155_v52, %v2155_v52  ;;  %v2154_v42 = vadd.f32 %v2153_v7, %v2152_v57  ;;  %v2156_v47 = vmul.f32 0.125, %v2140_v61 }
 0x2f8   :  { %v2161_v9 = vsub.f32 %v2157_v53, %v2159_v21  ;;  %v2158_v10 = vmul.f32 0.125, %v2154_v42  ;;  %v2160_v11 = vmul.f32 %v2156_v47, %v2156_v47 }
 0x2fa   :  { %v2163_v12 = vmax.f32 %v2161_v9, 0.0  ;;  %v2162_v13 = vsub.f32 %v2158_v10, %v2160_v11 }
 0x2fc   :  { %v2166_v14 = vadd.f32 1e-05, %v2163_v12  ;;  %v2164_v15 = vmax.f32 %v2162_v13, 0.0 }
 0x2fe   :  { %v2167_v31 = vadd.f32 1e-05, %v2164_v15  ;;  %4811 = vrsqrt.f32 %v2166_v14  ;;  %v4713_v15 = vld [vmem:[#allocation10 + $0x210] ss:$8 sps:$4 sm:$0xff]  }
 0x300   :  { %4813 = vrsqrt.f32 %v2167_v31  ;;  %v4718_v31 = vld [vmem:[#allocation10 + $0x204] ss:$8 sps:$4 sm:$0xff]  }
 0x30b   :  { %v4812_v16 = vpop.eup %4811 }
 0x30d   :  { %v4814_v17 = vpop.eup %4813 }
 0x30e   :  { %v2172_v20 = vcombine.low %v4812_v16, %v4814_v17 }
 0x310   :  { %v2179_v22 = vrot.slane %v2172_v20, %v5134_v33 }
 0x312   :  { %v2186_v18 = vrot.slane %v2179_v22, %v5134_v33 }
 0x314   :  { %v2188_v24 = vmul.f32 %v2186_v18, %v2165_v23 }
 0x316   :  { %v2194_v25 = vrot.slane %v2188_v24, %v5142_v41  ;;  %v2198_v26 = vrot.slane %v2188_v24, %v5145_v43 }
 0x318   :  { %v2201_v28 = vmul.f32 %v2194_v25, %v2155_v52  ;;  %v2202_v29 = vmul.f32 %v2198_v26, %v2156_v47  ;;  %v2222_v30 = vmul.f32 %v2194_v25, %v2127_v36  ;;  %v2223_v32 = vmul.f32 %v2198_v26, %v2128_v62 }
 0x31a   :  { %v2205_v34 = vcombine.low %v2201_v28, %v2202_v29 }
 0x31c   :  { %v2212_v35 = vrot.slane %v2205_v34, %v5134_v33 }
 0x31e   :  { %v2219_v37 = vrot.slane %v2212_v35, %v5134_v33  ;;  %v2428_v35 = vld [vmem:[#allocation3 + $0x4] sm:$0xf] }
 0x320   :  { %v2221_v45 = vsub.f32 %v2189_v19, %v2219_v37 }
 0x322   :  { %v2228_v46 = vrot.slane %v2221_v45, %v5142_v41  ;;  %v2232_v63 = vrot.slane %v2221_v45, %v5145_v43 }
 0x324   :  { %v2235_v59 = vadd.f32 %v2228_v46, %v2222_v30  ;;  %v2236_v0 = vadd.f32 %v2232_v63, %v2223_v32  ;;  %v2425_v32 = vld [vmem:[#allocation3] sm:$0xf] }
 0x326   :  { %v2237_v48 = vmax.f32 %v2235_v59, 0.0  ;;  %v2238_v50 = vmax.f32 %v2236_v0, 0.0 }
 0x328   :  { %v2241_v36 = vcombine.low %v2237_v48, %v2238_v50  ;;  %v2242_v62 = vcombine.high %v2237_v48, %v2238_v50  ;;  %v4138_v49 = vcombine.low %v2238_v50, %v2238_v50  ;;  %v4139_v54 = vcombine.high %v2238_v50, %v2238_v50 }
 0x32a   :  { %v4140_v1 = vpack.c.bf16 %v4138_v49, %v2241_v36  ;;  %v4141_v2 = vpack.c.bf16 %v4139_v54, %v2242_v62 }
 0x32c   :  { %v2264_v40 = vrot.slane %v4140_v1, %v5134_v33  ;;  %v2287_v51 = vrot.slane %v4141_v2, %v5134_v33 }
 0x32e   :  { %v2265_v4 = vcombine.high %v2264_v40, %v2264_v40  ;;  %v2272_v44 = vrot.slane %v2264_v40, %v5134_v33  ;;  %v2288_v5 = vcombine.high %v2287_v51, %v2287_v51  ;;  %v2295_v3 = vrot.slane %v2287_v51, %v5134_v33  ;;  %v4695_v40 = vld [vmem:[#allocation10 + $0x270] ss:$8 sps:$4 sm:$0xff]  }
 0x330   :  { %v2279_v38 = vrot.slane %v2265_v4, %v5134_v33  ;;  %v2302_v6 = vrot.slane %v2288_v5, %v5134_v33  ;;  %v2309_v56 = vrot.slane %v2272_v44, %v5163_v8  ;;  %v2323_v58 = vrot.slane %v2295_v3, %v5163_v8  ;;  %v4700_v5 = vld [vmem:[#allocation10 + $0x264] ss:$8 sps:$4 sm:$0xff]  }
 0x332   :  { %v2316_v55 = vrot.slane %v2279_v38, %v5163_v8  ;;  %v2330_v60 = vrot.slane %v2302_v6, %v5163_v8  ;;  %v2337_v57 = vrot.slane %v2309_v56, %v5265_v27  ;;  %v2351_v39 = vrot.slane %v2323_v58, %v5265_v27 }
 0x334   :  { %v2344_v52 = vrot.slane %v2316_v55, %v5265_v27  ;;  %v2358_v61 = vrot.slane %v2330_v60, %v5265_v27  ;;  %v2359_v47 = vunpack.c.l.b16 %v2337_v57  ;;  %v2360_v9 = vunpack.c.h.b16 %v2337_v57  ;;  %v4698_v57 = vld [vmem:[#allocation10 + $0x260] ss:$8 sps:$4 sm:$0xff]  }
 0x335   :  { %v2363_v8 = vunpack.c.l.b16 %v2351_v39  ;;  %v2364_v10 = vunpack.c.h.b16 %v2351_v39 }
 0x336   :  { %v2361_v7 = vunpack.c.l.b16 %v2344_v52  ;;  %v2362_v53 = vunpack.c.h.b16 %v2344_v52  ;;  %v2365_v21 = vunpack.c.l.b16 %v2358_v61  ;;  %v2366_v42 = vunpack.c.h.b16 %v2358_v61  ;;  %v4703_v61 = vld [vmem:[#allocation10 + $0x254] ss:$8 sps:$4 sm:$0xff]  }
 0x338   :  { %v2367_v11 = vrot.slane %v2361_v7, 7  ;;  %v2370_v12 = vrot.slane %v2362_v53, 7  ;;  %v2372_v13 = vrot.slane %v2365_v21, 7  ;;  %v2374_v14 = vrot.slane %v2366_v42, 7  ;;  %v4701_v21 = vld [vmem:[#allocation10 + $0x250] ss:$8 sps:$4 sm:$0xff]  }
 0x33a   :  { %v2369_v16 = vsel %vm180_vm14, %v2367_v11, %v2359_v47  ;;  %v2371_v17 = vsel %vm180_vm14, %v2370_v12, %v2360_v9  ;;  %v2373_v20 = vsel %vm180_vm14, %v2372_v13, %v2363_v8  ;;  %v2375_v22 = vsel %vm180_vm14, %v2374_v14, %v2364_v10 }
 0x33b   :  { %v2376_v23 = vpack.c.b16 %v2371_v17, %v2369_v16  ;;  %v2377_v18 = vpack.c.b16 %v2375_v22, %v2373_v20  ;;  %v2396_v24 = vsel %vm151_vm5, %v2367_v11, %v2359_v47  ;;  %v2397_v25 = vsel %vm151_vm5, %v2370_v12, %v2360_v9  ;;  %v4706_v47 = vld [vmem:[#allocation10 + $0x244] ss:$8 sps:$4 sm:$0xff]   ;;  %v4707_v11 = vld [vmem:[#allocation10 + $0x230] ss:$8 sps:$4 sm:$0xff]   ;;  %v4716_v16 = vld [vmem:[#allocation10 + $0x200] ss:$8 sps:$4 sm:$0xff]  }
 0x33c   :  { %v2398_v26 = vsel %vm151_vm5, %v2372_v13, %v2363_v8  ;;  %v2399_v28 = vsel %vm151_vm5, %v2374_v14, %v2364_v10  ;;  %v2400_v29 = vpack.c.b16 %v2397_v25, %v2396_v24  ;;  %vm3009_vm5 = vmor %vm3007_vm1, %vm3008_vm2  ;;  %v4704_v8 = vld [vmem:[#allocation10 + $0x240] ss:$8 sps:$4 sm:$0xff]   ;;  %v4709_v10 = vld [vmem:[#allocation10 + $0x234] ss:$8 sps:$4 sm:$0xff]  }
 0x33d   :  { %4142 = vst.sshfl [vmem:[#allocation3 + $0x8] sm:$0x11 pattern:$0x76325410] %v2376_v23  ;;  %v2401_v30 = vpack.c.b16 %v2399_v28, %v2398_v26  ;;  %vm3011_vm10 = vmor %vm3009_vm5, %vm3010_vm6  ;;  %v4712_v12 = vld [vmem:[#allocation10 + $0x224] ss:$8 sps:$4 sm:$0xff]  }
 0x33e   :  { %4143 = vst.sshfl [vmem:[#allocation3 + $0xc] sm:$0x11 pattern:$0x76325410] %v2377_v18  ;;  %v2408_v34 = vrot.slane %v2400_v29, %v5265_v27  ;;  %vm3013_vm12 = vmor %vm3011_vm10, %vm3012_vm4  ;;  %v4710_v13 = vld [vmem:[#allocation10 + $0x220] ss:$8 sps:$4 sm:$0xff]  }
 0x33f   :  { %v2415_v19 = vrot.slane %v2401_v30, %v5265_v27  ;;  %vm3015_vm13 = vmor %vm3013_vm12, %vm3014_vm7  ;;  %v4715_v14 = vld [vmem:[#allocation10 + $0x214] ss:$8 sps:$4 sm:$0xff]   ;;  %v4719_v20 = vld [vmem:[#allocation10 + $0x2f0] ss:$8 sps:$4 sm:$0xff]  }
 0x340   :  { %v2426_v37 = vsel %vm2424_vm0, %v2408_v34, %v2425_v32  ;;  %vm3017_vm15 = vmor %vm3015_vm13, %vm3016_vm3  ;;  %v4721_v17 = vld [vmem:[#allocation10 + $0x2f4] ss:$8 sps:$4 sm:$0xff]   ;;  %v4724_v22 = vld [vmem:[#allocation10 + $0x2e4] ss:$8 sps:$4 sm:$0xff]  }
 0x341   :  { %v2429_v45 = vsel %vm2424_vm0, %v2415_v19, %v2428_v35  ;;  %2427 = vst [vmem:[#allocation3] sm:$0xf] %v2426_v37  ;;  %v4722_v23 = vld [vmem:[#allocation10 + $0x2e0] ss:$8 sps:$4 sm:$0xff]   ;;  %v4727_v18 = vld [vmem:[#allocation10 + $0x2d4] ss:$8 sps:$4 sm:$0xff]  }
 0x342   :  { %2430 = vst [vmem:[#allocation3 + $0x4] sm:$0xf] %v2429_v45  ;;  %v4725_v24 = vld [vmem:[#allocation10 + $0x2d0] ss:$8 sps:$4 sm:$0xff]   ;;  %v4730_v25 = vld [vmem:[#allocation10 + $0x2c4] ss:$8 sps:$4 sm:$0xff]  }
 0x343   :  { %v4728_v26 = vld [vmem:[#allocation10 + $0x2c0] ss:$8 sps:$4 sm:$0xff]   ;;  %v4733_v28 = vld [vmem:[#allocation10 + $0x2b4] ss:$8 sps:$4 sm:$0xff]   ;;  %v4731_v29 = vld [vmem:[#allocation10 + $0x2b0] ss:$8 sps:$4 sm:$0xff]  }
 0x344   :  { %v4146_v46 = vld.sshfl [vmem:[#allocation3 + $0x8] sm:$0x3 pattern:$0x75316420]  ;;  %v4736_v30 = vld [vmem:[#allocation10 + $0x2a4] ss:$8 sps:$4 sm:$0xff]  }
 0x345   :  { %v4147_v63 = vld.sshfl [vmem:[#allocation3 + $0xc] sm:$0x3 pattern:$0x75316420]  ;;  %v4734_v32 = vld [vmem:[#allocation10 + $0x2a0] ss:$8 sps:$4 sm:$0xff]  }
 0x346   :  { %v2532_v59 = vcombine.low %v4146_v46, %v4147_v63  ;;  %v4739_v34 = vld [vmem:[#allocation10 + $0x294] ss:$8 sps:$4 sm:$0xff]   ;;  %v4737_v35 = vld [vmem:[#allocation10 + $0x290] ss:$8 sps:$4 sm:$0xff]   ;;  %v4742_v19 = vld [vmem:[#allocation10 + $0x284] ss:$8 sps:$4 sm:$0xff]  }
 0x347   :  { %v4740_v37 = vld [vmem:[#allocation10 + $0x280] ss:$8 sps:$4 sm:$0xff]   ;;  %v4745_v46 = vld [vmem:[#allocation12 + $0x74] ss:$8 sps:$4 sm:$0xff]   ;;  %v4743_v63 = vld [vmem:[#allocation12 + $0x70] ss:$8 sps:$4 sm:$0xff]  }
 0x348   :  { %v2539_v0 = vrot.slane %v2532_v59, %v5134_v33  ;;  %v4144_v48 = vld.sshfl [vmem:[#allocation3] sm:$0x3 pattern:$0x75316420]  ;;  %3699 = vmatprep.subr.bf16.mxu1 %v4745_v46  ;;  %v4748_v59 = vld [vmem:[#allocation12 + $0x64] ss:$8 sps:$4 sm:$0xff]  }
 0x349   :  { %v4145_v50 = vld.sshfl [vmem:[#allocation3 + $0x4] sm:$0x3 pattern:$0x75316420] }
 0x34a   :  { %v2540_v36 = vcombine.high %v2539_v0, %v2539_v0  ;;  %v2758_v62 = vcombine.low %v4144_v48, %v4145_v50  ;;  %v4212_v49 = vld.sshfl [vmem:[#allocation3] sm:$0x33 pattern:$0x75316420]  ;;  %v2547_v44 = vrot.slane %v2539_v0, %v5134_v33  ;;  %v4751_v48 = vld [vmem:[#allocation12 + $0x54] ss:$8 sps:$4 sm:$0xff]  }
 0x34b   :  { %v4213_v54 = vld.sshfl [vmem:[#allocation3 + $0x4] sm:$0x33 pattern:$0x75316420]  ;;  %v2995_v1 = vcombine.high %v4212_v49, %v4212_v49  ;;  %v3019_v3 = vshrl.u32 %v4212_v49, 16 }
 0x34c   :  { %v2554_v2 = vrot.slane %v2540_v36, %v5134_v33  ;;  %v2765_v51 = vrot.slane %v2758_v62, %v5134_v33  ;;  %v3003_v4 = vcombine.high %v4213_v54, %v4213_v54  ;;  %v3028_v56 = vshrl.u32 %v4213_v54, 16  ;;  %v4746_v0 = vld [vmem:[#allocation12 + $0x60] ss:$8 sps:$4 sm:$0xff]   ;;  %v4749_v50 = vld [vmem:[#allocation12 + $0x50] ss:$8 sps:$4 sm:$0xff]  }
 0x34d   :  { %v3024_v38 = vshll.u32 %v2995_v1, 16  ;;  %v4754_v36 = vld [vmem:[#allocation12 + $0x44] ss:$8 sps:$4 sm:$0xff]   ;;  %v4752_v62 = vld [vmem:[#allocation12 + $0x40] ss:$8 sps:$4 sm:$0xff]  }
 0x34e   :  { %2749 = vmatprep.mubr.bf16.mxu0 %v2554_v2  ;;  %v2766_v6 = vcombine.high %v2765_v51, %v2765_v51  ;;  %v3033_v58 = vshll.u32 %v3003_v4, 16  ;;  %v2773_v52 = vrot.slane %v2765_v51, %v5134_v33  ;;  %v4757_v49 = vld [vmem:[#allocation12 + $0x34] ss:$8 sps:$4 sm:$0xff]   ;;  %v4755_v54 = vld [vmem:[#allocation12 + $0x30] ss:$8 sps:$4 sm:$0xff]  }
 0x34f   :  { %2750 = vmatmul.mubr.bf16.vlgmr.msra.gmra.mxu0 %v2547_v44  ;;  %v3026_v55 = vsel %vm3017_vm15, %v3019_v3, %v3024_v38  ;;  %v4760_v1 = vld [vmem:[#allocation12 + $0x24] ss:$8 sps:$4 sm:$0xff]   ;;  %v4758_v2 = vld [vmem:[#allocation12 + $0x20] ss:$8 sps:$4 sm:$0xff]   ;;  %v4761_v51 = vld [vmem:[#allocation12 + $0x10] ss:$8 sps:$4 sm:$0xff]  }
 0x350   :  { %3255 = vmatpush1.bf16.msra.mxu0 %v4695_v40  ;;  %v2780_v60 = vrot.slane %v2766_v6, %v5134_v33  ;;  %v3035_v39 = vsel %vm3017_vm15, %v3028_v56, %v3033_v58  ;;  %v4763_v40 = vld [vmem:[#allocation12 + $0x14] ss:$8 sps:$4 sm:$0xff]   ;;  %v4766_v44 = vld [vmem:[#allocation12 + $0x4] ss:$8 sps:$4 sm:$0xff]   ;;  %v4764_v3 = vld [vmem:[#allocation12] ss:$8 sps:$4 sm:$0xff]  }
 0x351   :  { %3256 = vmatprep.subr.bf16.mxu0 %v4700_v5  ;;  %v3069_v7 = vcombine.low %v3026_v55, %v3035_v39  ;;  %v4769_v56 = vld [vmem:[#allocation12 + $0xf4] ss:$8 sps:$4 sm:$0xff]   ;;  %v4772_v39 = vld [vmem:[#allocation12 + $0xe4] ss:$8 sps:$4 sm:$0xff]  }
 0x352   :  { %2975 = vmatprep.mubr.bf16.mxu1 %v2780_v60  ;;  %v4767_v60 = vld [vmem:[#allocation12 + $0xf0] ss:$8 sps:$4 sm:$0xff]  }
 0x353   :  { %2976 = vmatmul.mubr.bf16.vlgmr.msra.gmra.mxu1 %v2773_v52  ;;  %v3076_v53 = vrot.slane %v3069_v7, %v5134_v33  ;;  %v4773_v7 = vld [vmem:[#allocation12 + $0xd0] ss:$8 sps:$4 sm:$0xff]  }
 0x354   :  { %3257 = vmatpush1.bf16.msra.mxu0 %v4698_v57  ;;  %3700 = vmatpush1.bf16.msra.mxu1 %v4743_v63 }
 0x355   :  { %3258 = vmatprep.subr.bf16.mxu0 %v4703_v61  ;;  %v3077_v42 = vcombine.high %v3076_v53, %v3076_v53  ;;  %v3084_v45 = vrot.slane %v3076_v53, %v5134_v33  ;;  %3701 = vmatprep.subr.bf16.mxu1 %v4748_v59  ;;  %v4770_v61 = vld [vmem:[#allocation12 + $0xe0] ss:$8 sps:$4 sm:$0xff]   ;;  %v4775_v53 = vld [vmem:[#allocation12 + $0xd4] ss:$8 sps:$4 sm:$0xff]  }
 0x357   :  { %v3091_v9 = vrot.slane %v3077_v42, %v5134_v33  ;;  %v4776_v42 = vld [vmem:[#allocation12 + $0xc0] ss:$8 sps:$4 sm:$0xff]  }
 0x358   :  { %3259 = vmatpush1.bf16.msra.mxu0 %v4701_v21  ;;  %3702 = vmatpush1.bf16.msra.mxu1 %v4746_v0  ;;  %v4778_v21 = vld [vmem:[#allocation12 + $0xc4] ss:$8 sps:$4 sm:$0xff]  }
 0x359   :  { %3286 = vmatprep.mubr.bf16.mxu0 %v3091_v9  ;;  %3260 = vmatprep.subr.bf16.mxu0 %v4706_v47  ;;  %v4781_v47 = vld [vmem:[#allocation12 + $0xb4] ss:$8 sps:$4 sm:$0xff]   ;;  %v4779_v9 = vld [vmem:[#allocation12 + $0xb0] ss:$8 sps:$4 sm:$0xff]  }
 0x35a   :  { %3703 = vmatprep.subr.bf16.mxu1 %v4751_v48 }
 0x35c   :  { %3261 = vmatpush1.bf16.msra.mxu0 %v4704_v8  ;;  %3704 = vmatpush1.bf16.msra.mxu1 %v4749_v50  ;;  %v4784_v8 = vld [vmem:[#allocation12 + $0xa4] ss:$8 sps:$4 sm:$0xff]  }
 0x35d   :  { %3262 = vmatprep.subr.bf16.mxu0 %v4709_v10  ;;  %3705 = vmatprep.subr.bf16.mxu1 %v4754_v36  ;;  %v4782_v10 = vld [vmem:[#allocation12 + $0xa0] ss:$8 sps:$4 sm:$0xff]  }
 0x360   :  { %3263 = vmatpush1.bf16.msra.mxu0 %v4707_v11  ;;  %3706 = vmatpush1.bf16.msra.mxu1 %v4752_v62  ;;  %v4787_v11 = vld [vmem:[#allocation12 + $0x94] ss:$8 sps:$4 sm:$0xff]  }
 0x361   :  { %3264 = vmatprep.subr.bf16.mxu0 %v4712_v12  ;;  %3707 = vmatprep.subr.bf16.mxu1 %v4757_v49  ;;  %v4785_v12 = vld [vmem:[#allocation12 + $0x90] ss:$8 sps:$4 sm:$0xff]  }
 0x364   :  { %3265 = vmatpush1.bf16.msra.mxu0 %v4710_v13  ;;  %3708 = vmatpush1.bf16.msra.mxu1 %v4755_v54  ;;  %v4790_v13 = vld [vmem:[#allocation12 + $0x84] ss:$8 sps:$4 sm:$0xff]  }
 0x365   :  { %3266 = vmatprep.subr.bf16.mxu0 %v4715_v14  ;;  %3709 = vmatprep.subr.bf16.mxu1 %v4760_v1  ;;  %v4788_v14 = vld [vmem:[#allocation12 + $0x80] ss:$8 sps:$4 sm:$0xff]  }
 0x368   :  { %3267 = vmatpush1.bf16.msra.mxu0 %v4713_v15  ;;  %3710 = vmatpush1.bf16.msra.mxu1 %v4758_v2 }
 0x369   :  { %3268 = vmatprep.subr.bf16.mxu0 %v4718_v31  ;;  %3711 = vmatprep.subr.bf16.mxu1 %v4763_v40 }
 0x36c   :  { %3269 = vmatpush1.bf16.msra.mxu0 %v4716_v16  ;;  %3712 = vmatpush1.bf16.msra.mxu1 %v4761_v51 }
 0x36d   :  { %3270 = vmatprep.subr.bf16.mxu0 %v4721_v17  ;;  %3713 = vmatprep.subr.bf16.mxu1 %v4766_v44 }
 0x370   :  { %3271 = vmatpush2.bf16.msra.mxu0 %v4719_v20  ;;  %3714 = vmatpush1.bf16.msra.mxu1 %v4764_v3 }
 0x371   :  { %3272 = vmatprep.subr.bf16.mxu0 %v4724_v22  ;;  %3715 = vmatprep.subr.bf16.mxu1 %v4769_v56 }
 0x374   :  { %3273 = vmatpush2.bf16.msra.mxu0 %v4722_v23  ;;  %3716 = vmatpush2.bf16.msra.mxu1 %v4767_v60 }
 0x375   :  { %3274 = vmatprep.subr.bf16.mxu0 %v4727_v18  ;;  %3717 = vmatprep.subr.bf16.mxu1 %v4772_v39 }
 0x378   :  { %3275 = vmatpush2.bf16.msra.mxu0 %v4725_v24  ;;  %3718 = vmatpush2.bf16.msra.mxu1 %v4770_v61 }
 0x379   :  { %3276 = vmatprep.subr.bf16.mxu0 %v4730_v25  ;;  %3719 = vmatprep.subr.bf16.mxu1 %v4775_v53 }
 0x37c   :  { %3277 = vmatpush2.bf16.msra.mxu0 %v4728_v26  ;;  %3720 = vmatpush2.bf16.msra.mxu1 %v4773_v7 }
 0x37d   :  { %3278 = vmatprep.subr.bf16.mxu0 %v4733_v28  ;;  %3721 = vmatprep.subr.bf16.mxu1 %v4778_v21 }
 0x380   :  { %3279 = vmatpush2.bf16.msra.mxu0 %v4731_v29  ;;  %3722 = vmatpush2.bf16.msra.mxu1 %v4776_v42 }
 0x381   :  { %3280 = vmatprep.subr.bf16.mxu0 %v4736_v30  ;;  %3723 = vmatprep.subr.bf16.mxu1 %v4781_v47 }
 0x384   :  { %3281 = vmatpush2.bf16.msra.mxu0 %v4734_v32  ;;  %3724 = vmatpush2.bf16.msra.mxu1 %v4779_v9 }
 0x385   :  { %3282 = vmatprep.subr.bf16.mxu0 %v4739_v34  ;;  %3725 = vmatprep.subr.bf16.mxu1 %v4784_v8  ;;  %v3338_v8 = vld [vmem:[%s5442_s8] sm:$0x3] }
 0x388   :  { %3283 = vmatpush2.bf16.msra.mxu0 %v4737_v35  ;;  %3726 = vmatpush2.bf16.msra.mxu1 %v4782_v10 }
 0x389   :  { %3284 = vmatprep.subr.bf16.mxu0 %v4742_v19  ;;  %3727 = vmatprep.subr.bf16.mxu1 %v4787_v11 }
 0x38c   :  { %3285 = vmatpush2.bf16.msra.mxu0 %v4740_v37  ;;  %3728 = vmatpush2.bf16.msra.mxu1 %v4785_v12 }
 0x38d   :  { %3729 = vmatprep.subr.bf16.mxu1 %v4790_v13 }
 0x38f   :  { %3287 = vmatmul.mubr.bf16.vlgmr.msra.gmra.mxu0 %v3084_v45 }
 0x390   :  { %3730 = vmatpush2.bf16.msra.mxu1 %v4788_v14 }
 0x40f   :  { %v2751_v4 = vpop.f32.mrf.mxu0 }
 0x411   :  { %v2753_v5 = vpop.f32.mrf.mxu0 }
 0x413   :  { %v2977_v38 = vpop.f32.mrf.mxu1  ;;  %v2755_v6 = vpop.f32.mrf.mxu0 }
 0x414   :  { %v2978_v15 = vadd.f32 %v2977_v38, %v2751_v4 }
 0x415   :  { %v2979_v58 = vpop.f32.mrf.mxu1  ;;  %v2756_v55 = vpop.f32.mrf.mxu0 }
 0x416   :  { %v2980_v16 = vadd.f32 %v2979_v58, %v2753_v5 }
 0x417   :  { %v2981_v57 = vpop.f32.mrf.mxu1 }
 0x419   :  { %v2982_v52 = vpop.f32.mrf.mxu1 }
 0x44f   :  { %v3288_v31 = vpop.f32.mrf.mxu0 }
 0x450   :  { %v5388_v17 = vadd.f32 %v3288_v31, %v2978_v15 }
 0x451   :  { %v3290_v20 = vpop.f32.mrf.mxu0 }
 0x452   :  { %v3298_v22 = vsel %vm3297_vm8, %v5388_v17, 0.0  ;;  %v3312_v23 = vmul.f32 %v5388_v17, %v5388_v17  ;;  %v3296_v18 = vadd.f32 %v3290_v20, %v2980_v16  ;;  %v3362_v20 = vld [vmem:[%s5443_s9] sm:$0x3] }
 0x453   :  { %v3299_v24 = vrot.slane %v3298_v22, 4  ;;  %v3292_v25 = vpop.f32.mrf.mxu0 }
 0x454   :  { %v3314_v26 = vsel %vm3297_vm8, %v3312_v23, 0.0  ;;  %v3305_v28 = vsel %vm3297_vm8, %v3296_v18, 0.0  ;;  %v3313_v29 = vmul.f32 %v3296_v18, %v3296_v18 }
 0x455   :  { %v3300_v30 = vadd.f32 %v3299_v24, %v3298_v22  ;;  %v3315_v32 = vrot.slane %v3314_v26, 4  ;;  %v3306_v34 = vrot.slane %v3305_v28, 4  ;;  %v3293_v35 = vpop.f32.mrf.mxu0 }
 0x456   :  { %v3321_v19 = vsel %vm3297_vm8, %v3313_v29, 0.0 }
 0x457   :  { %v3301_v37 = vrot.slane %v3300_v30, 2  ;;  %v3316_v45 = vadd.f32 %v3315_v32, %v3314_v26  ;;  %v3307_v46 = vadd.f32 %v3306_v34, %v3305_v28  ;;  %v3322_v63 = vrot.slane %v3321_v19, 4 }
 0x459   :  { %v3302_v59 = vadd.f32 %v3301_v37, %v3300_v30  ;;  %v3317_v0 = vrot.slane %v3316_v45, 2  ;;  %v3308_v48 = vrot.slane %v3307_v46, 2  ;;  %v3323_v50 = vadd.f32 %v3322_v63, %v3321_v19 }
 0x45b   :  { %v3303_v36 = vrot.slane %v3302_v59, 1  ;;  %v3318_v62 = vadd.f32 %v3317_v0, %v3316_v45  ;;  %v3309_v49 = vadd.f32 %v3308_v48, %v3307_v46  ;;  %v3324_v54 = vrot.slane %v3323_v50, 2 }
 0x45d   :  { %v3304_v1 = vadd.f32 %v3303_v36, %v3302_v59  ;;  %v3319_v2 = vrot.slane %v3318_v62, 1  ;;  %v3310_v40 = vrot.slane %v3309_v49, 1  ;;  %v3325_v51 = vadd.f32 %v3324_v54, %v3323_v50 }
 0x45f   :  { %v3320_v4 = vadd.f32 %v3319_v2, %v3318_v62  ;;  %v3328_v44 = vmul.f32 0.25, %v3304_v1  ;;  %v3311_v5 = vadd.f32 %v3310_v40, %v3309_v49  ;;  %v3326_v3 = vrot.slane %v3325_v51, 1 }
 0x461   :  { %v3330_v38 = vmul.f32 0.25, %v3320_v4  ;;  %v3332_v6 = vmul.f32 %v3328_v44, %v3328_v44  ;;  %v3327_v56 = vadd.f32 %v3326_v3, %v3325_v51  ;;  %v3329_v58 = vmul.f32 0.25, %v3311_v5 }
 0x463   :  { %v3334_v55 = vsub.f32 %v3330_v38, %v3332_v6  ;;  %v3331_v60 = vmul.f32 0.25, %v3327_v56  ;;  %v3333_v57 = vmul.f32 %v3329_v58, %v3329_v58 }
 0x465   :  { %v3336_v39 = vmax.f32 %v3334_v55, 0.0  ;;  %v3335_v52 = vsub.f32 %v3331_v60, %v3333_v57 }
 0x467   :  { %v3339_v61 = vadd.f32 1e-05, %v3336_v39  ;;  %v3337_v7 = vmax.f32 %v3335_v52, 0.0 }
 0x469   :  { %v3340_v53 = vadd.f32 1e-05, %v3337_v7  ;;  %4815 = vrsqrt.f32 %v3339_v61 }
 0x46b   :  { %4817 = vrsqrt.f32 %v3340_v53 }
 0x476   :  { %v4816_v21 = vpop.eup %4815 }
 0x478   :  { %v4818_v42 = vpop.eup %4817 }
 0x479   :  { %v3345_v47 = vcombine.low %v4816_v21, %v4818_v42 }
 0x47b   :  { %v3352_v9 = vrot.slane %v3345_v47, %v5134_v33 }
 0x47d   :  { %v3359_v10 = vrot.slane %v3352_v9, %v5134_v33 }
 0x47f   :  { %v3361_v11 = vmul.f32 %v3359_v10, %v3338_v8 }
 0x481   :  { %v3367_v12 = vrot.slane %v3361_v11, %v5142_v41  ;;  %v3371_v13 = vrot.slane %v3361_v11, %v5145_v43 }
 0x483   :  { %v3374_v14 = vmul.f32 %v3367_v12, %v3328_v44  ;;  %v3375_v15 = vmul.f32 %v3371_v13, %v3329_v58  ;;  %v3395_v24 = vmul.f32 %v3367_v12, %v5388_v17  ;;  %v3396_v25 = vmul.f32 %v3371_v13, %v3296_v18 }
 0x485   :  { %v3378_v31 = vcombine.low %v3374_v14, %v3375_v15 }
 0x487   :  { %v3385_v16 = vrot.slane %v3378_v31, %v5134_v33 }
 0x489   :  { %v3392_v22 = vrot.slane %v3385_v16, %v5134_v33 }
 0x48b   :  { %v3394_v23 = vsub.f32 %v3362_v20, %v3392_v22  ;;  %v4791_v20 = vld [vmem:[#allocation13 + $0x78] sm:$0xff]  }
 0x48c   :  { %v4792_v22 = vld [vmem:[#allocation13 + $0x38] sm:$0xff]   ;;  %4297 = vmatprep.subr.bf16.mxu0 %v4791_v20 }
 0x48d   :  { %v3401_v26 = vrot.slane %v3394_v23, %v5142_v41  ;;  %v3405_v28 = vrot.slane %v3394_v23, %v5145_v43  ;;  %v4793_v23 = vld [vmem:[#allocation13 + $0x70] sm:$0xff]   ;;  %4298 = vmatpush3.bf16.msra.mxu0 %v4792_v22 }
 0x48e   :  { %4299 = vmatprep.subr.bf16.mxu0 %v4793_v23 }
 0x48f   :  { %v3408_v29 = vadd.f32 %v3401_v26, %v3395_v24  ;;  %v3409_v30 = vadd.f32 %v3405_v28, %v3396_v25  ;;  %v4794_v24 = vld [vmem:[#allocation13 + $0x30] sm:$0xff]   ;;  %v4795_v25 = vld [vmem:[#allocation13 + $0x68] sm:$0xff]  }
 0x490   :  { %v4796_v26 = vld [vmem:[#allocation13 + $0x28] sm:$0xff]  }
 0x491   :  { %v3410_v32 = vmax.f32 %v3408_v29, 0.0  ;;  %v3411_v34 = vmax.f32 %v3409_v30, 0.0  ;;  %4300 = vmatpush3.bf16.msra.mxu0 %v4794_v24  ;;  %v3513_v28 = vld [vmem:[%s5445_s11] sm:$0x3] }
 0x492   :  { %4301 = vmatprep.subr.bf16.mxu0 %v4795_v25  ;;  %v3518_v29 = vrot.slane %v3513_v28, %v5142_v41  ;;  %v3522_v30 = vrot.slane %v3513_v28, %v5145_v43  ;;  %v4800_v41 = vld [vmem:[#allocation13 + $0x18] sm:$0xff]   ;;  %v4801_v43 = vld [vmem:[#allocation13 + $0x50] sm:$0xff]  }
 0x493   :  { %v3414_v35 = vcombine.low %v3410_v32, %v3411_v34 }
 0x495   :  { %v3421_v19 = vrot.slane %v3414_v35, %v5265_v27  ;;  %4302 = vmatpush3.bf16.msra.mxu0 %v4796_v26 }
 0x497   :  { %v3422_v37 = vcombine.high %v3421_v19, %v3421_v19  ;;  %v3429_v45 = vrot.slane %v3421_v19, %v5265_v27 }
 0x499   :  { %v3430_v46 = vcombine.high %v3429_v45, %v3429_v45  ;;  %v3437_v33 = vrot.slane %v3422_v37, %v5265_v27  ;;  %v3444_v17 = vsel %vm2418_vm11, %v3429_v45, 0.0 }
 0x49a   :  { %v3445_v18 = vrot.slane %v3444_v17, 4 }
 0x49b   :  { %v3458_v63 = vsel %vm2418_vm11, %v3437_v33, 0.0  ;;  %v3438_v59 = vcombine.high %v3437_v33, %v3437_v33  ;;  %v3451_v0 = vsel %vm2418_vm11, %v3430_v46, 0.0 }
 0x49c   :  { %v3446_v48 = vadd.f32 %v3445_v18, %v3444_v17  ;;  %v3459_v50 = vrot.slane %v3458_v63, 4  ;;  %v3452_v36 = vrot.slane %v3451_v0, 4 }
 0x49d   :  { %v3465_v62 = vsel %vm2418_vm11, %v3438_v59, 0.0  ;;  %v4797_v59 = vld [vmem:[#allocation13 + $0x60] sm:$0xff]  }
 0x49e   :  { %v3453_v49 = vadd.f32 %v3452_v36, %v3451_v0  ;;  %v3466_v54 = vrot.slane %v3465_v62, 4  ;;  %v3447_v1 = vrot.slane %v3446_v48, 2  ;;  %v3460_v2 = vadd.f32 %v3459_v50, %v3458_v63  ;;  %v4798_v0 = vld [vmem:[#allocation13 + $0x20] sm:$0xff]   ;;  %4303 = vmatprep.subr.bf16.mxu0 %v4797_v59  ;;  %v4802_v50 = vld [vmem:[#allocation13 + $0x10] sm:$0xff]   ;;  %v4803_v36 = vld [vmem:[#allocation13 + $0x48] sm:$0xff]  }
 0x49f   :  { %4304 = vmatpush3.bf16.msra.mxu0 %v4798_v0 }
 0x4a0   :  { %v3454_v40 = vrot.slane %v3453_v49, 2  ;;  %v3467_v51 = vadd.f32 %v3466_v54, %v3465_v62  ;;  %v3448_v27 = vadd.f32 %v3447_v1, %v3446_v48  ;;  %v3461_v4 = vrot.slane %v3460_v2, 2  ;;  %v4799_v48 = vld [vmem:[#allocation13 + $0x58] sm:$0xff]   ;;  %v4804_v62 = vld [vmem:[#allocation13 + $0x8] sm:$0xff]   ;;  %v4806_v54 = vld [vmem:[#allocation13] sm:$0xff]  }
 0x4a1   :  { %4305 = vmatprep.subr.bf16.mxu0 %v4799_v48 }
 0x4a2   :  { %v3455_v44 = vadd.f32 %v3454_v40, %v3453_v49  ;;  %v3468_v5 = vrot.slane %v3467_v51, 2  ;;  %v3449_v3 = vrot.slane %v3448_v27, 1  ;;  %v3462_v38 = vadd.f32 %v3461_v4, %v3460_v2  ;;  %v4805_v49 = vld [vmem:[#allocation13 + $0x40] sm:$0xff]  }
 0x4a3   :  { %4306 = vmatpush3.bf16.msra.mxu0 %v4800_v41 }
 0x4a4   :  { %v3456_v6 = vrot.slane %v3455_v44, 1  ;;  %v3469_v56 = vadd.f32 %v3468_v5, %v3467_v51  ;;  %v3450_v58 = vadd.f32 %v3449_v3, %v3448_v27  ;;  %v3463_v55 = vrot.slane %v3462_v38, 1  ;;  %4307 = vmatprep.subr.bf16.mxu0 %v4801_v43  ;;  %v4280_v3 = vld [vmem:[%s5447_s13] ss:$0 sm:$0xff] }
 0x4a6   :  { %v3457_v60 = vadd.f32 %v3456_v6, %v3455_v44  ;;  %v3470_v57 = vrot.slane %v3469_v56, 1  ;;  %v3464_v39 = vadd.f32 %v3463_v55, %v3462_v38  ;;  %v3473_v52 = vmul.f32 0.5, %v3450_v58 }
 0x4a7   :  { %4308 = vmatpush3.bf16.msra.mxu0 %v4802_v50 }
 0x4a8   :  { %v3471_v61 = vadd.f32 %v3470_v57, %v3469_v56  ;;  %v3474_v7 = vmul.f32 0.5, %v3457_v60  ;;  %v3475_v53 = vmul.f32 0.5, %v3464_v39  ;;  %v3477_v21 = vpack.c.bf16 %v3473_v52, %v3473_v52  ;;  %4309 = vmatprep.subr.bf16.mxu0 %v4803_v36 }
 0x4aa   :  { %v3476_v42 = vmul.f32 0.5, %v3471_v61  ;;  %v3478_v47 = vpack.c.bf16 %v3474_v7, %v3474_v7  ;;  %v3479_v9 = vpack.c.bf16 %v3475_v53, %v3475_v53  ;;  %v3529_v11 = vunpack.c.l.b16 %v3477_v21 }
 0x4ab   :  { %4310 = vmatpush3.bf16.msra.mxu0 %v4804_v62 }
 0x4ac   :  { %v3480_v8 = vpack.c.bf16 %v3476_v42, %v3476_v42  ;;  %v3531_v10 = vunpack.c.l.b16 %v3479_v9  ;;  %v3530_v12 = vunpack.c.l.b16 %v3478_v47  ;;  %4311 = vmatprep.subr.bf16.mxu0 %v4805_v49 }
 0x4ae   :  { %v3532_v13 = vunpack.c.l.b16 %v3480_v8  ;;  %v3533_v14 = vsel %vm180_vm14, %v3531_v10, %v3529_v11 }
 0x4af   :  { %v3535_v16 = vpack.c.b16 %v3533_v14, %v3533_v14  ;;  %4312 = vmatpush3.bf16.msra.mxu0 %v4806_v54 }
 0x4b0   :  { %v3534_v15 = vsel %vm180_vm14, %v3532_v13, %v3530_v12 }
 0x4b1   :  { %v3536_v31 = vpack.c.b16 %v3534_v15, %v3534_v15 }
 0x4b3   :  { %3731 = vmatprep.mubr.bf16.mxu1 %v3536_v31 }
 0x4b4   :  { %3732 = vmatmul.mubr.bf16.vlgmr.msra.gmra.mxu1 %v3535_v16 }
 0x574   :  { %v3733_v32 = vpop.f32.mrf.mxu1 }
 0x575   :  { %v3734_v34 = vadd.f32 %v3733_v32, %v3518_v29 }
 0x576   :  { %v3735_v35 = vpop.f32.mrf.mxu1 }
 0x577   :  { %v3740_v19 = vmul.f32 %v3734_v34, %v3734_v34  ;;  %v3736_v37 = vadd.f32 %v3735_v35, %v3522_v30 }
 0x578   :  { %v3737_v45 = vpop.f32.mrf.mxu1 }
 0x579   :  { %v3741_v46 = vmul.f32 %v3736_v37, %v3736_v37  ;;  %v3742_v17 = vsel %vm2418_vm11, %v3740_v19, 0.0 }
 0x57a   :  { %v3738_v33 = vpop.f32.mrf.mxu1 }
 0x57b   :  { %v3743_v18 = vsel %vm2418_vm11, %v3741_v46, 0.0 }
 0x57c   :  { %v3744_v63 = vadd.f32 %v3743_v18, %v3742_v17 }
 0x57e   :  { %3745 = vadd.xlane.f32.xlu0 %v3744_v63 }
 0x607   :  { %v3746_v1 = vpop.xlane.xlu0 %3745 }
 0x608   :  { %v3747_v2 = vmax.f32 %v3746_v1, 1e-24 }
 0x60a   :  { %4819 = vrsqrt.f32 %v3747_v2 }
 0x617   :  { %v4820_v40 = vpop.eup %4819 }
 0x618   :  { %v3750_v51 = vmul.f32 %v4820_v40, %v3736_v37  ;;  %v3749_v27 = vmul.f32 %v4820_v40, %v3734_v34 }
 0x61a   :  { %v3752_v4 = vpack.c.bf16 %v3750_v51, %v3750_v51  ;;  %v3751_v44 = vpack.c.bf16 %v3749_v27, %v3749_v27 }
 0x61c   :  { %3920 = vmatprep.mubr.bf16.mxu0 %v3752_v4 }
 0x61d   :  { %3921 = vmatmul.mubr.bf16.vlgmr.msra.gmra.mxu0 %v3751_v44 }
 0x6dd   :  { %v4313_v5 = vpop.f32.mrf.mxu0 }
 0x6df   :  { %v4314_v38 = vpop.f32.mrf.mxu0 }
 0x6e0   :  { %v4315_v6 = vadd.f32 %v4314_v38, %v4313_v5 }
 0x6e1   :  { %v4316_v56 = vpop.f32.mrf.mxu0 }
 0x6e2   :  { %v3923_v58 = vadd.f32 %v4315_v6, %v4280_v3 }
 0x6e3   :  { %v4317_v55 = vpop.f32.mrf.mxu0 }
 0x6e4   :  { %3928 = vst [vmem:[#allocation15] sm:$0x3] %v3923_v58 }
 0x6e5   :  { %4952 = shalt.err (!%p4949_p6)
}
 0x6e6   :  { %3938 = dma.vmem_to_hbm [thread:$0]  %s3936_s19, 32, %s5448_s14, [#allocation6]  }
 0x6e7   :  { %4969 = dma.done.wait [#allocation6], 32  }
 0x6e8   :  { %4970 = vsyncadd [#allocation6], 4294967264 }
 0x6e9   :  { %3942 = vsyncpa [#allocation5], 1 }
 0x6ea   :  { %3943 = vsyncpa [#allocation8], 1 }
 0x6eb   :  { %3944 = vsyncpa [#allocation11], 1 }
 0x6ec   :  { %3945 = vsyncpa [#allocation14], 1 }
 0x6ed   :  { %3946 = vsyncpa [#allocation6], 1 }

</bundles_post_ra>
